<compile_context>
chip_gen: v7x
topology: tpu7x:2x2x1
jax: 0.10.0
libtpu: 0.0.40
codegen_flags: <defaults>
</compile_context>

<pallas_src>
import functools

import numpy as np
import jax
import jax.numpy as jnp
from jax import lax
from jax.experimental import pallas as pl
from jax.experimental.pallas import tpu as pltpu

EPS = 1e-6
_INV_SQRT2 = 0.7071067811865476

# operand order for the pallas_call (after the two feature maps)
_KERNEL_PARAM_ORDER = ("w1", "w1e", "w3", "w4", "b4", "w5", "wys",
                       "cvec", "dwvec", "sevec", "seb1", "ovec")


# ---------------------------------------------------------------------------
# in-kernel helpers (all operate on (C, H*W) values)
# ---------------------------------------------------------------------------
def _gelu(x):
    # exact erf-based GELU, matching torch.nn.GELU()
    return 0.5 * x * (1.0 + lax.erf(x * _INV_SQRT2))


def _layernorm_c(x, w, b):
    # LayerNorm2d on (C, HW): mean / biased variance over the channel
    # (sublane) axis; w, b are (C, 1) columns broadcast over lanes.
    mu = jnp.mean(x, axis=0, keepdims=True)
    var = jnp.mean((x - mu) ** 2, axis=0, keepdims=True)
    return (x - mu) * lax.rsqrt(var + EPS) * w + b


# ---------------------------------------------------------------------------
# the fused kernel: one grid step == one (Bblk, c, HW) batch block
# ---------------------------------------------------------------------------
def _cross_kernel(img_ref, ev_ref,
                  w1_ref, w1e_ref, w3_ref, w4_ref, b4_ref, w5_ref, wys_ref,
                  cvec_ref, dwvec_ref, sevec_ref, seb1_ref, ovec_ref,
                  out_ref, *, H, W, dw, bblk, compute_dtype):
    HW = H * W
    C2 = 2 * dw
    half = dw // 2

    # ---- unpack the packed bias/scale operands once per grid step ----
    cv = cvec_ref[...]                                   # (c, 8)
    n1w, n1b = cv[:, 0:1], cv[:, 1:2]
    n1ew, n1eb = cv[:, 2:3], cv[:, 3:4]
    n2w, n2b = cv[:, 4:5], cv[:, 5:6]
    b3, beta = cv[:, 6:7], cv[:, 7:8]
    dv = dwvec_ref[...]                                  # (2*dw, 11), image rows first
    k9, b1s, bdws = dv[:, 0:9], dv[:, 9:10], dv[:, 10:11]
    sv = sevec_ref[...]                                  # (dw, dw + 1)
    sew1t = sv[:, 0:half]                                # (dw, dw//2) = sew1.T
    sew2 = sv[:, half:2 * half]                          # (dw, dw//2)
    seb2 = sv[:, 2 * half:2 * half + 1]                  # (dw, 1)
    seb1 = seb1_ref[...]                                 # (1, dw//2)
    ov = ovec_ref[...]                                   # (c_out, 3)
    b5, bys, gamma = ov[:, 0:1], ov[:, 1:2], ov[:, 2:3]
    b4 = b4_ref[...]                                     # (ffn, 1)
    w1, w1e = w1_ref[...], w1e_ref[...]
    w3, w4, w5, wys = w3_ref[...], w4_ref[...], w5_ref[...], wys_ref[...]

    def mm(w, x):
        # 1x1 conv == (Cout, Cin) @ (Cin, HW).  Weights are pre-cast at pack
        # time; only the activation needs a cast on the bf16 path.
        if compute_dtype != jnp.float32:
            x = x.astype(compute_dtype)
            if w.dtype != compute_dtype:
                w = w.astype(compute_dtype)
        return jnp.dot(w, x, preferred_element_type=jnp.float32)

    # ---- dwconv boundary masks: only the 4 primitives stay live; they are
    # built once at the stacked (2*dw, HW) shape (no per-tap broadcast) and the
    # corner masks are ANDed inline per tap.
    pix = lax.broadcasted_iota(jnp.int32, (C2, HW), 1)
    col = pix % W
    m_left = col > 0                 # a pixel to the left exists
    m_right = col < (W - 1)          # a pixel to the right exists
    m_top = pix >= W                 # a row above exists
    m_bot = pix < (HW - W)           # a row below exists
    # TODO(synk): for very large H*W, add an HW-tiled grid axis (with +/-W-pixel
    # halos for the dwconv and a two-pass SE pool) so mask/activation live
    # ranges and the VMEM working set stay bounded (v7x has only 64 MiB).

    def dwconv3x3_stacked(x):
        # depthwise 3x3, stride 1, pad 1 on the stacked (2*dw, HW) tensor;
        # tap[p] = x[p + dy*W + dx] via a lane roll (XLU) + boundary mask.
        out = x * k9[:, 4:5]                             # centre tap (0, 0)
        for dy in (-1, 0, 1):
            for dx in (-1, 0, 1):
                if dy == 0 and dx == 0:
                    continue
                shift = dy * W + dx
                tap = pltpu.roll(x, shift=(-shift) % HW, axis=1)
                m = m_top if dy < 0 else (m_bot if dy > 0 else None)
                if dx < 0:
                    m = m_left if m is None else jnp.logical_and(m, m_left)
                elif dx > 0:
                    m = m_right if m is None else jnp.logical_and(m, m_right)
                tap = jnp.where(m, tap, 0.0)
                kidx = (dy + 1) * 3 + (dx + 1)
                out = out + tap * k9[:, kidx:kidx + 1]
        return out + bdws

    # ---- static unroll over the Bblk batch elements of this grid step ----
    for b in range(bblk):
        img = img_ref[b].astype(jnp.float32)             # (c, HW) image_feat
        ev = ev_ref[b].astype(jnp.float32)               # (c, HW) event_feat

        x = _layernorm_c(img, n1w, n1b)                  # norm1
        xe = _layernorm_c(ev, n1ew, n1eb)                # norm1_e

        # conv1 / conv1_e, then stack both modalities on the sublane axis so
        # the dwconv, GELU, SE scale and conv3 each run ONCE on full vregs.
        z = jnp.concatenate([mm(w1, x), mm(w1e, xe)], axis=0) + b1s   # (2*dw, HW)
        z = dwconv3x3_stacked(z)                         # conv2 / conv2_e
        z = _gelu(z)

        # ---- se_1(x_e): pool over pixels -> 1x1 -> ReLU -> 1x1 -> sigmoid,
        # kept on the VPU/XLU (tiny reduces), off the MXU path.  The event
        # branch is rows dw:2*dw of the stacked tensor.
        pooled = jnp.mean(z[dw:, :], axis=1, keepdims=True)           # (dw, 1)
        h = jnp.sum(sew1t * pooled, axis=0, keepdims=True) + seb1     # (1, dw//2)
        h = jnp.maximum(h, 0.0)
        se = jax.nn.sigmoid(jnp.sum(sew2 * h, axis=1, keepdims=True) + seb2)  # (dw,1)
        z = z * jnp.concatenate([se, se], axis=0)        # scale both branches

        # conv3 over the already-stacked [x ; x_e] channels (no extra concat).
        x3 = mm(w3, z) + b3

        # y = event_feat + image_feat + x * beta          (dropout1 is identity)
        y = ev + img + x3 * beta

        # ---- FFN: conv4(norm2(y)) -> GELU -> conv5; side path conv_y_side(y)
        t = _layernorm_c(y, n2w, n2b)
        x4 = _gelu(mm(w4, t) + b4)
        x5 = mm(w5, x4) + b5
        ys = mm(wys, y) + bys

        out_ref[b] = (ys + x5 * gamma).astype(out_ref.dtype)


# ---------------------------------------------------------------------------
# parameter packing (torch-layout dict -> kernel operands, all 2-D)
# ---------------------------------------------------------------------------
def _pack_kernel_params(p, matmul_dtype):
    col = lambda v: v.reshape(-1, 1)
    cast = lambda w: w.astype(matmul_dtype)              # pre-cast once (bf16 path)
    cvec = jnp.concatenate(
        [col(p["n1w"]), col(p["n1b"]), col(p["n1ew"]), col(p["n1eb"]),
         col(p["n2w"]), col(p["n2b"]), col(p["b3"]), col(p["beta"])], axis=1)
    # stacked depthwise params: image rows first, event rows second, matching
    # the in-kernel stack order and conv3's channel-concat order.
    dwvec = jnp.concatenate(
        [jnp.concatenate([p["kdw"], p["kdwe"]], axis=0),
         jnp.concatenate([col(p["b1"]), col(p["b1e"])], axis=0),
         jnp.concatenate([col(p["bdw"]), col(p["bdwe"])], axis=0)], axis=1)
    sevec = jnp.concatenate([p["sew1"].T, p["sew2"], col(p["seb2"])], axis=1)
    ovec = jnp.concatenate([col(p["b5"]), col(p["bys"]), col(p["gamma"])], axis=1)
    return dict(
        w1=cast(p["w1"]), w1e=cast(p["w1e"]), w3=cast(p["w3"]),
        w4=cast(p["w4"]), b4=col(p["b4"]), w5=cast(p["w5"]), wys=cast(p["wys"]),
        cvec=cvec, dwvec=dwvec, sevec=sevec,
        seb1=p["seb1"].reshape(1, -1), ovec=ovec)


def _pick_batch_block(B, per_batch_bytes, budget_bytes):
    # largest divisor of B whose working set fits the VMEM budget, while keeping
    # >= 2 grid steps whenever B >= 2 so both v7x TensorCores get work.
    best = 1
    for bb in range(1, B + 1):
        if B % bb:
            continue
        if bb * per_batch_bytes > budget_bytes:
            continue
        if B >= 2 and (B // bb) < 2:
            continue
        best = bb
    return best


# ---------------------------------------------------------------------------
# wrapper
# ---------------------------------------------------------------------------
def crossmodal_forward(event_nchw, image_nchw, params, *, use_bf16_matmul=False):
    # use_bf16_matmul=True is recommended on v6e/v7x (bf16-native MXU, halves
    # weight DMA bytes); keep False on v5e and whenever f32-level accuracy is
    # required (it is False here so the 1e-3 check against the f32 ref holds).
    B, c, H, W = image_nchw.shape
    HW = H * W
    dw = params["w1"].shape[0]
    dw2 = 2 * dw
    ffn = params["w4"].shape[0]
    c_out = params["wys"].shape[0]

    out_dtype = image_nchw.dtype          # bf16 feature I/O halves HBM traffic
    in_bytes = image_nchw.dtype.itemsize
    out_bytes = jnp.dtype(out_dtype).itemsize

    img = image_nchw.reshape(B, c, HW)
    ev = event_nchw.reshape(B, c, HW)

    matmul_dtype = jnp.bfloat16 if use_bf16_matmul else jnp.float32
    kp = _pack_kernel_params(params, matmul_dtype)
    weights = [kp[name] for name in _KERNEL_PARAM_ORDER]
    weight_bytes = sum(int(w.size) * w.dtype.itemsize for w in weights)

    # per-batch-element VMEM working set: double-buffered feature I/O, live f32
    # intermediates, and the four stacked boundary masks.  Budget is v7x-safe
    # (64 MiB physical); raise toward ~96 MiB on v5e/v6e (128 MiB) if desired.
    per_batch_bytes = HW * (4 * in_bytes * c + 2 * out_bytes * c_out
                            + 4 * (2 * c + 3 * dw2 + ffn + 2 * c + c_out)
                            + 4 * 4 * dw2)
    vmem_budget = 40 << 20
    bblk = _pick_batch_block(B, per_batch_bytes, vmem_budget)
    n_steps = B // bblk

    feat_spec = pl.BlockSpec((bblk, c, HW), lambda g: (g, 0, 0))
    weight_specs = [pl.BlockSpec(w.shape, lambda g, _nd=w.ndim: (0,) * _nd)
                    for w in weights]

    # advisory cost estimate so XLA can overlap surrounding ops with the kernel
    flops = 2 * B * HW * (2 * c * dw + 9 * dw2 + c * dw2
                          + c * ffn + ffn * c_out + c * c_out)
    transcendentals = B * HW * (dw2 + ffn + 3)
    bytes_accessed = (B * HW * (2 * c * in_bytes + c_out * out_bytes)
                      + weight_bytes)

    out = pl.pallas_call(
        functools.partial(_cross_kernel, H=H, W=W, dw=dw, bblk=bblk,
                          compute_dtype=matmul_dtype),
        out_shape=jax.ShapeDtypeStruct((B, c_out, HW), out_dtype),
        grid=(n_steps,),
        in_specs=[feat_spec, feat_spec] + weight_specs,
        out_specs=pl.BlockSpec((bblk, c_out, HW), lambda g: (g, 0, 0)),
        compiler_params=pltpu.CompilerParams(
            dimension_semantics=("parallel",),      # batch steps shard across TCs
            vmem_limit_bytes=48 * 1024 * 1024),     # below v7x's 64 MiB physical
        cost_estimate=pl.CostEstimate(flops=int(flops),
                                      transcendentals=int(transcendentals),
                                      bytes_accessed=int(bytes_accessed)),
    )(img, ev, *weights)
    return out.reshape(B, c_out, H, W)


# ---------------------------------------------------------------------------
# deterministic parameter init (torch-native shapes; module's beta/gamma
# default to zeros but are randomized here for coverage)
# ---------------------------------------------------------------------------
def init_params(key, c, c_out, dw_expand=1, ffn_expand=2):
    dw = c * dw_expand
    ffn = ffn_expand * c
    shapes = dict(
        n1w=(c,), n1b=(c,), n1ew=(c,), n1eb=(c,), n2w=(c,), n2b=(c,),
        w1=(dw, c), b1=(dw,), kdw=(dw, 9), bdw=(dw,),
        w1e=(dw, c), b1e=(dw,), kdwe=(dw, 9), bdwe=(dw,),
        sew1=(dw // 2, dw), seb1=(dw // 2,), sew2=(dw, dw // 2), seb2=(dw,),
        w3=(c, 2 * dw), b3=(c,),
        w4=(ffn, c), b4=(ffn,), w5=(c_out, ffn), b5=(c_out,),
        wys=(c_out, c), bys=(c_out,),
        beta=(c,), gamma=(c_out,),
    )
    names = sorted(shapes)
    keys = jax.random.split(key, len(names))
    return {n: 0.2 * jax.random.normal(k, shapes[n], jnp.float32)
            for n, k in zip(names, keys)}


# ---------------------------------------------------------------------------
# pure-JAX NCHW reference (mirrors the PyTorch module with lax.conv)
# ---------------------------------------------------------------------------
def reference_forward(event_nchw, image_nchw, p):
    P = lax.Precision.HIGHEST
    DN = ("NCHW", "OIHW", "NCHW")

    def ln(x, w, b):
        mu = jnp.mean(x, axis=1, keepdims=True)
        var = jnp.mean((x - mu) ** 2, axis=1, keepdims=True)
        return (x - mu) / jnp.sqrt(var + EPS) * w.reshape(1, -1, 1, 1) + b.reshape(1, -1, 1, 1)

    def conv1x1(x, w, b):                       # w: (Cout, Cin)
        y = lax.conv_general_dilated(x, w[:, :, None, None], (1, 1), "VALID",
                                     dimension_numbers=DN, precision=P)
        return y + b.reshape(1, -1, 1, 1)

    def dwconv(x, k9, b):                       # k9: (C, 9)
        C = x.shape[1]
        w4d = k9.reshape(C, 1, 3, 3)
        y = lax.conv_general_dilated(x, w4d, (1, 1), ((1, 1), (1, 1)),
                                     dimension_numbers=DN,
                                     feature_group_count=C, precision=P)
        return y + b.reshape(1, -1, 1, 1)

    def gelu(x):
        return 0.5 * x * (1.0 + lax.erf(x * _INV_SQRT2))

    x = ln(image_nchw, p["n1w"], p["n1b"])
    xe = ln(event_nchw, p["n1ew"], p["n1eb"])
    x = gelu(dwconv(conv1x1(x, p["w1"], p["b1"]), p["kdw"], p["bdw"]))
    xe = gelu(dwconv(conv1x1(xe, p["w1e"], p["b1e"]), p["kdwe"], p["bdwe"]))

    pooled = jnp.mean(xe, axis=(2, 3), keepdims=True)
    se = conv1x1(pooled, p["sew1"], p["seb1"])
    se = jnp.maximum(se, 0.0)
    se = jax.nn.sigmoid(conv1x1(se, p["sew2"], p["seb2"]))

    x = x * se
    xe = xe * se
    xcat = jnp.concatenate([x, xe], axis=1)
    x = conv1x1(xcat, p["w3"], p["b3"])

    y = event_nchw + image_nchw + x * p["beta"].reshape(1, -1, 1, 1)
    t = ln(y, p["n2w"], p["n2b"])
    x = gelu(conv1x1(t, p["w4"], p["b4"]))
    x = conv1x1(x, p["w5"], p["b5"])
    ys = conv1x1(y, p["wys"], p["bys"])
    return ys + x * p["gamma"].reshape(1, -1, 1, 1)


# ---------------------------------------------------------------------------
if __name__ == "__main__":
    B, c, c_out, H, W = 2, 4, 8, 16, 16
    key = jax.random.PRNGKey(0)
    k_img, k_ev, k_par = jax.random.split(key, 3)

    image_nchw = jax.random.normal(k_img, (B, c, H, W), jnp.float32)
    event_nchw = jax.random.normal(k_ev, (B, c, H, W), jnp.float32)
    params = init_params(k_par, c, c_out)

    # f32 matmuls by default so the 1e-3 tolerance holds; set
    # use_bf16_matmul=True on v6e/v7x deployments for the bf16-native MXU.
    out = crossmodal_forward(event_nchw, image_nchw, params)
    out = jax.block_until_ready(out)

    ref = reference_forward(event_nchw, image_nchw, params)
    np.testing.assert_allclose(np.asarray(out), np.asarray(ref),
                               rtol=1e-3, atol=1e-3)
    print("KERNEL_OK")
</pallas_src>

<mosaic_0001>
module attributes {stable_mosaic.version = 11 : i64} {
  func.func @_cross_kernel(%arg0: i32, %arg1: memref<1x4x256xf32, #tpu.memory_space<vmem>>, %arg2: memref<1x4x256xf32, #tpu.memory_space<vmem>>, %arg3: memref<4x4xf32, #tpu.memory_space<vmem>>, %arg4: memref<4x4xf32, #tpu.memory_space<vmem>>, %arg5: memref<4x8xf32, #tpu.memory_space<vmem>>, %arg6: memref<8x4xf32, #tpu.memory_space<vmem>>, %arg7: memref<8x1xf32, #tpu.memory_space<vmem>>, %arg8: memref<8x8xf32, #tpu.memory_space<vmem>>, %arg9: memref<8x4xf32, #tpu.memory_space<vmem>>, %arg10: memref<4x8xf32, #tpu.memory_space<vmem>>, %arg11: memref<8x11xf32, #tpu.memory_space<vmem>>, %arg12: memref<4x5xf32, #tpu.memory_space<vmem>>, %arg13: memref<1x2xf32, #tpu.memory_space<vmem>>, %arg14: memref<8x3xf32, #tpu.memory_space<vmem>>, %arg15: memref<1x8x256xf32, #tpu.memory_space<vmem>>) attributes {dimension_semantics = [#tpu.dimension_semantics<parallel>], iteration_bounds = array<i64: 2>, scalar_prefetch = 0 : i64, scratch_operands = 0 : i64, tpu.core_type = #tpu.core_type<tc>, window_params = [{transform_indices = @transform_0, window_bounds = array<i64: 1, 4, 256>}, {transform_indices = @transform_1, window_bounds = array<i64: 1, 4, 256>}, {pipeline_mode = #tpu.pipeline_mode<synchronous>, transform_indices = @transform_2, window_bounds = array<i64: 4, 4>}, {pipeline_mode = #tpu.pipeline_mode<synchronous>, transform_indices = @transform_3, window_bounds = array<i64: 4, 4>}, {pipeline_mode = #tpu.pipeline_mode<synchronous>, transform_indices = @transform_4, window_bounds = array<i64: 4, 8>}, {pipeline_mode = #tpu.pipeline_mode<synchronous>, transform_indices = @transform_5, window_bounds = array<i64: 8, 4>}, {pipeline_mode = #tpu.pipeline_mode<synchronous>, transform_indices = @transform_6, window_bounds = array<i64: 8, 1>}, {pipeline_mode = #tpu.pipeline_mode<synchronous>, transform_indices = @transform_7, window_bounds = array<i64: 8, 8>}, {pipeline_mode = #tpu.pipeline_mode<synchronous>, transform_indices = @transform_8, window_bounds = array<i64: 8, 4>}, {pipeline_mode = #tpu.pipeline_mode<synchronous>, transform_indices = @transform_9, window_bounds = array<i64: 4, 8>}, {pipeline_mode = #tpu.pipeline_mode<synchronous>, transform_indices = @transform_10, window_bounds = array<i64: 8, 11>}, {pipeline_mode = #tpu.pipeline_mode<synchronous>, transform_indices = @transform_11, window_bounds = array<i64: 4, 5>}, {pipeline_mode = #tpu.pipeline_mode<synchronous>, transform_indices = @transform_12, window_bounds = array<i64: 1, 2>}, {pipeline_mode = #tpu.pipeline_mode<synchronous>, transform_indices = @transform_13, window_bounds = array<i64: 8, 3>}, {transform_indices = @transform_14, window_bounds = array<i64: 1, 8, 256>}]} {
    %c0 = arith.constant 0 : index
    %c0_0 = arith.constant 0 : index
    %0 = vector.load %arg10[%c0, %c0_0] : memref<4x8xf32, #tpu.memory_space<vmem>>, vector<4x8xf32>
    %1 = vector.extract_strided_slice %0 {offsets = [0, 0], sizes = [4, 1], strides = [1, 1]} : vector<4x8xf32> to vector<4x1xf32>
    %2 = vector.extract_strided_slice %0 {offsets = [0, 1], sizes = [4, 1], strides = [1, 1]} : vector<4x8xf32> to vector<4x1xf32>
    %3 = vector.extract_strided_slice %0 {offsets = [0, 2], sizes = [4, 1], strides = [1, 1]} : vector<4x8xf32> to vector<4x1xf32>
    %4 = vector.extract_strided_slice %0 {offsets = [0, 3], sizes = [4, 1], strides = [1, 1]} : vector<4x8xf32> to vector<4x1xf32>
    %5 = vector.extract_strided_slice %0 {offsets = [0, 4], sizes = [4, 1], strides = [1, 1]} : vector<4x8xf32> to vector<4x1xf32>
    %6 = vector.extract_strided_slice %0 {offsets = [0, 5], sizes = [4, 1], strides = [1, 1]} : vector<4x8xf32> to vector<4x1xf32>
    %7 = vector.extract_strided_slice %0 {offsets = [0, 6], sizes = [4, 1], strides = [1, 1]} : vector<4x8xf32> to vector<4x1xf32>
    %8 = vector.extract_strided_slice %0 {offsets = [0, 7], sizes = [4, 1], strides = [1, 1]} : vector<4x8xf32> to vector<4x1xf32>
    %c0_1 = arith.constant 0 : index
    %c0_2 = arith.constant 0 : index
    %9 = vector.load %arg11[%c0_1, %c0_2] : memref<8x11xf32, #tpu.memory_space<vmem>>, vector<8x11xf32>
    %10 = vector.extract_strided_slice %9 {offsets = [0, 0], sizes = [8, 9], strides = [1, 1]} : vector<8x11xf32> to vector<8x9xf32>
    %11 = vector.extract_strided_slice %9 {offsets = [0, 9], sizes = [8, 1], strides = [1, 1]} : vector<8x11xf32> to vector<8x1xf32>
    %12 = vector.extract_strided_slice %9 {offsets = [0, 10], sizes = [8, 1], strides = [1, 1]} : vector<8x11xf32> to vector<8x1xf32>
    %c0_3 = arith.constant 0 : index
    %c0_4 = arith.constant 0 : index
    %13 = vector.load %arg12[%c0_3, %c0_4] : memref<4x5xf32, #tpu.memory_space<vmem>>, vector<4x5xf32>
    %14 = vector.extract_strided_slice %13 {offsets = [0, 0], sizes = [4, 2], strides = [1, 1]} : vector<4x5xf32> to vector<4x2xf32>
    %15 = vector.extract_strided_slice %13 {offsets = [0, 2], sizes = [4, 2], strides = [1, 1]} : vector<4x5xf32> to vector<4x2xf32>
    %16 = vector.extract_strided_slice %13 {offsets = [0, 4], sizes = [4, 1], strides = [1, 1]} : vector<4x5xf32> to vector<4x1xf32>
    %c0_5 = arith.constant 0 : index
    %c0_6 = arith.constant 0 : index
    %17 = vector.load %arg13[%c0_5, %c0_6] : memref<1x2xf32, #tpu.memory_space<vmem>>, vector<1x2xf32>
    %c0_7 = arith.constant 0 : index
    %c0_8 = arith.constant 0 : index
    %18 = vector.load %arg14[%c0_7, %c0_8] : memref<8x3xf32, #tpu.memory_space<vmem>>, vector<8x3xf32>
    %19 = vector.extract_strided_slice %18 {offsets = [0, 0], sizes = [8, 1], strides = [1, 1]} : vector<8x3xf32> to vector<8x1xf32>
    %20 = vector.extract_strided_slice %18 {offsets = [0, 1], sizes = [8, 1], strides = [1, 1]} : vector<8x3xf32> to vector<8x1xf32>
    %21 = vector.extract_strided_slice %18 {offsets = [0, 2], sizes = [8, 1], strides = [1, 1]} : vector<8x3xf32> to vector<8x1xf32>
    %c0_9 = arith.constant 0 : index
    %c0_10 = arith.constant 0 : index
    %22 = vector.load %arg7[%c0_9, %c0_10] : memref<8x1xf32, #tpu.memory_space<vmem>>, vector<8x1xf32>
    %c0_11 = arith.constant 0 : index
    %c0_12 = arith.constant 0 : index
    %23 = vector.load %arg3[%c0_11, %c0_12] : memref<4x4xf32, #tpu.memory_space<vmem>>, vector<4x4xf32>
    %c0_13 = arith.constant 0 : index
    %c0_14 = arith.constant 0 : index
    %24 = vector.load %arg4[%c0_13, %c0_14] : memref<4x4xf32, #tpu.memory_space<vmem>>, vector<4x4xf32>
    %c0_15 = arith.constant 0 : index
    %c0_16 = arith.constant 0 : index
    %25 = vector.load %arg5[%c0_15, %c0_16] : memref<4x8xf32, #tpu.memory_space<vmem>>, vector<4x8xf32>
    %c0_17 = arith.constant 0 : index
    %c0_18 = arith.constant 0 : index
    %26 = vector.load %arg6[%c0_17, %c0_18] : memref<8x4xf32, #tpu.memory_space<vmem>>, vector<8x4xf32>
    %c0_19 = arith.constant 0 : index
    %c0_20 = arith.constant 0 : index
    %27 = vector.load %arg8[%c0_19, %c0_20] : memref<8x8xf32, #tpu.memory_space<vmem>>, vector<8x8xf32>
    %c0_21 = arith.constant 0 : index
    %c0_22 = arith.constant 0 : index
    %28 = vector.load %arg9[%c0_21, %c0_22] : memref<8x4xf32, #tpu.memory_space<vmem>>, vector<8x4xf32>
    %29 = tpu.iota {dimensions = array<i32: 1>} : vector<8x256xi32>
    %c16_i32 = arith.constant 16 : i32
    %c0_i32 = arith.constant 0 : i32
    %30 = arith.cmpi eq, %c16_i32, %c0_i32 : i32
    %c1_i32 = arith.constant 1 : i32
    %31 = arith.select %30, %c1_i32, %c16_i32 : i32
    %32 = vector.broadcast %31 : i32 to vector<8x256xi32>
    %33 = arith.remsi %29, %32 : vector<8x256xi32>
    %c0_i32_23 = arith.constant 0 : i32
    %34 = vector.broadcast %c0_i32_23 : i32 to vector<8x256xi32>
    %35 = arith.cmpi ne, %33, %34 : vector<8x256xi32>
    %c0_i32_24 = arith.constant 0 : i32
    %36 = vector.broadcast %c0_i32_24 : i32 to vector<8x256xi32>
    %37 = arith.cmpi slt, %33, %36 : vector<8x256xi32>
    %c0_i32_25 = arith.constant 0 : i32
    %38 = arith.cmpi slt, %31, %c0_i32_25 : i32
    %39 = vector.broadcast %38 : i1 to vector<8x256xi1>
    %40 = vector.broadcast %39 : vector<8x256xi1> to vector<8x256xi1>
    %41 = arith.xori %37, %40 : vector<8x256xi1>
    %42 = arith.andi %41, %35 : vector<8x256xi1>
    %43 = vector.broadcast %31 : i32 to vector<8x256xi32>
    %44 = arith.addi %33, %43 : vector<8x256xi32>
    %45 = arith.select %42, %44, %33 : vector<8x256xi1>, vector<8x256xi32>
    %c0_i32_26 = arith.constant 0 : i32
    %46 = vector.broadcast %c0_i32_26 : i32 to vector<8x256xi32>
    %47 = arith.cmpi sgt, %45, %46 : vector<8x256xi32>
    %c15_i32 = arith.constant 15 : i32
    %48 = vector.broadcast %c15_i32 : i32 to vector<8x256xi32>
    %49 = arith.cmpi slt, %45, %48 : vector<8x256xi32>
    %c16_i32_27 = arith.constant 16 : i32
    %50 = vector.broadcast %c16_i32_27 : i32 to vector<8x256xi32>
    %51 = arith.cmpi sge, %29, %50 : vector<8x256xi32>
    %c240_i32 = arith.constant 240 : i32
    %52 = vector.broadcast %c240_i32 : i32 to vector<8x256xi32>
    %53 = arith.cmpi slt, %29, %52 : vector<8x256xi32>
    %c0_28 = arith.constant 0 : index
    %c0_29 = arith.constant 0 : index
    %c0_30 = arith.constant 0 : index
    %54 = vector.load %arg1[%c0_28, %c0_29, %c0_30] : memref<1x4x256xf32, #tpu.memory_space<vmem>>, vector<1x4x256xf32>
    %55 = vector.shape_cast %54 : vector<1x4x256xf32> to vector<4x256xf32>
    %c0_31 = arith.constant 0 : index
    %c0_32 = arith.constant 0 : index
    %c0_33 = arith.constant 0 : index
    %56 = vector.load %arg2[%c0_31, %c0_32, %c0_33] : memref<1x4x256xf32, #tpu.memory_space<vmem>>, vector<1x4x256xf32>
    %57 = vector.shape_cast %56 : vector<1x4x256xf32> to vector<4x256xf32>
    %cst = arith.constant dense<0.000000e+00> : vector<256xf32>
    %58 = vector.multi_reduction <add>, %55, %cst [0] : vector<4x256xf32> to vector<256xf32>
    %59 = vector.shape_cast %58 : vector<256xf32> to vector<1x256xf32>
    %cst_34 = arith.constant 4.000000e+00 : f32
    %60 = vector.broadcast %cst_34 : f32 to vector<1x256xf32>
    %61 = arith.divf %59, %60 : vector<1x256xf32>
    %62 = vector.broadcast %61 : vector<1x256xf32> to vector<4x256xf32>
    %63 = arith.subf %55, %62 : vector<4x256xf32>
    %64 = arith.mulf %63, %63 : vector<4x256xf32>
    %cst_35 = arith.constant dense<0.000000e+00> : vector<256xf32>
    %65 = vector.multi_reduction <add>, %64, %cst_35 [0] : vector<4x256xf32> to vector<256xf32>
    %66 = vector.shape_cast %65 : vector<256xf32> to vector<1x256xf32>
    %cst_36 = arith.constant 4.000000e+00 : f32
    %67 = vector.broadcast %cst_36 : f32 to vector<1x256xf32>
    %68 = arith.divf %66, %67 : vector<1x256xf32>
    %69 = vector.broadcast %61 : vector<1x256xf32> to vector<4x256xf32>
    %70 = arith.subf %55, %69 : vector<4x256xf32>
    %cst_37 = arith.constant 9.99999997E-7 : f32
    %71 = vector.broadcast %cst_37 : f32 to vector<1x256xf32>
    %72 = arith.addf %68, %71 : vector<1x256xf32>
    %73 = math.rsqrt %72 : vector<1x256xf32>
    %74 = vector.broadcast %73 : vector<1x256xf32> to vector<4x256xf32>
    %75 = arith.mulf %70, %74 : vector<4x256xf32>
    %76 = vector.broadcast %1 : vector<4x1xf32> to vector<4x256xf32>
    %77 = arith.mulf %75, %76 : vector<4x256xf32>
    %78 = vector.broadcast %2 : vector<4x1xf32> to vector<4x256xf32>
    %79 = arith.addf %77, %78 : vector<4x256xf32>
    %cst_38 = arith.constant dense<0.000000e+00> : vector<256xf32>
    %80 = vector.multi_reduction <add>, %57, %cst_38 [0] : vector<4x256xf32> to vector<256xf32>
    %81 = vector.shape_cast %80 : vector<256xf32> to vector<1x256xf32>
    %cst_39 = arith.constant 4.000000e+00 : f32
    %82 = vector.broadcast %cst_39 : f32 to vector<1x256xf32>
    %83 = arith.divf %81, %82 : vector<1x256xf32>
    %84 = vector.broadcast %83 : vector<1x256xf32> to vector<4x256xf32>
    %85 = arith.subf %57, %84 : vector<4x256xf32>
    %86 = arith.mulf %85, %85 : vector<4x256xf32>
    %cst_40 = arith.constant dense<0.000000e+00> : vector<256xf32>
    %87 = vector.multi_reduction <add>, %86, %cst_40 [0] : vector<4x256xf32> to vector<256xf32>
    %88 = vector.shape_cast %87 : vector<256xf32> to vector<1x256xf32>
    %cst_41 = arith.constant 4.000000e+00 : f32
    %89 = vector.broadcast %cst_41 : f32 to vector<1x256xf32>
    %90 = arith.divf %88, %89 : vector<1x256xf32>
    %91 = vector.broadcast %83 : vector<1x256xf32> to vector<4x256xf32>
    %92 = arith.subf %57, %91 : vector<4x256xf32>
    %cst_42 = arith.constant 9.99999997E-7 : f32
    %93 = vector.broadcast %cst_42 : f32 to vector<1x256xf32>
    %94 = arith.addf %90, %93 : vector<1x256xf32>
    %95 = math.rsqrt %94 : vector<1x256xf32>
    %96 = vector.broadcast %95 : vector<1x256xf32> to vector<4x256xf32>
    %97 = arith.mulf %92, %96 : vector<4x256xf32>
    %98 = vector.broadcast %3 : vector<4x1xf32> to vector<4x256xf32>
    %99 = arith.mulf %97, %98 : vector<4x256xf32>
    %100 = vector.broadcast %4 : vector<4x1xf32> to vector<4x256xf32>
    %101 = arith.addf %99, %100 : vector<4x256xf32>
    %cst_43 = arith.constant dense<0.000000e+00> : vector<4x256xf32>
    %102 = tpu.matmul %23, %79, %cst_43 {dimension_numbers = #tpu.dot_dimension_numbers<[1], [0], [0], [1], [0, 0, 1, 1], [], []>} : vector<4x4xf32>, vector<4x256xf32>, vector<4x256xf32> -> vector<4x256xf32>
    %cst_44 = arith.constant dense<0.000000e+00> : vector<4x256xf32>
    %103 = tpu.matmul %24, %101, %cst_44 {dimension_numbers = #tpu.dot_dimension_numbers<[1], [0], [0], [1], [0, 0, 1, 1], [], []>} : vector<4x4xf32>, vector<4x256xf32>, vector<4x256xf32> -> vector<4x256xf32>
    %104 = tpu.concatenate %102, %103 in 0 : vector<4x256xf32>, vector<4x256xf32> -> vector<8x256xf32>
    %105 = vector.broadcast %11 : vector<8x1xf32> to vector<8x256xf32>
    %106 = arith.addf %104, %105 : vector<8x256xf32>
    %107 = vector.extract_strided_slice %10 {offsets = [0, 4], sizes = [8, 1], strides = [1, 1]} : vector<8x9xf32> to vector<8x1xf32>
    %108 = vector.broadcast %107 : vector<8x1xf32> to vector<8x256xf32>
    %109 = arith.mulf %106, %108 : vector<8x256xf32>
    %c17_i32 = arith.constant 17 : i32
    %110 = tpu.dynamic_rotate %106 by %c17_i32 dim 1 : vector<8x256xf32>, i32 -> vector<8x256xf32>
    %111 = arith.andi %51, %47 : vector<8x256xi1>
    %cst_45 = arith.constant 0.000000e+00 : f32
    %112 = vector.broadcast %cst_45 : f32 to vector<8x256xf32>
    %113 = arith.select %111, %110, %112 : vector<8x256xi1>, vector<8x256xf32>
    %114 = vector.extract_strided_slice %10 {offsets = [0, 0], sizes = [8, 1], strides = [1, 1]} : vector<8x9xf32> to vector<8x1xf32>
    %115 = vector.broadcast %114 : vector<8x1xf32> to vector<8x256xf32>
    %116 = arith.mulf %113, %115 : vector<8x256xf32>
    %117 = arith.addf %109, %116 : vector<8x256xf32>
    %c16_i32_46 = arith.constant 16 : i32
    %118 = tpu.dynamic_rotate %106 by %c16_i32_46 dim 1 : vector<8x256xf32>, i32 -> vector<8x256xf32>
    %cst_47 = arith.constant 0.000000e+00 : f32
    %119 = vector.broadcast %cst_47 : f32 to vector<8x256xf32>
    %120 = arith.select %51, %118, %119 : vector<8x256xi1>, vector<8x256xf32>
    %121 = vector.extract_strided_slice %10 {offsets = [0, 1], sizes = [8, 1], strides = [1, 1]} : vector<8x9xf32> to vector<8x1xf32>
    %122 = vector.broadcast %121 : vector<8x1xf32> to vector<8x256xf32>
    %123 = arith.mulf %120, %122 : vector<8x256xf32>
    %124 = arith.addf %117, %123 : vector<8x256xf32>
    %c15_i32_48 = arith.constant 15 : i32
    %125 = tpu.dynamic_rotate %106 by %c15_i32_48 dim 1 : vector<8x256xf32>, i32 -> vector<8x256xf32>
    %126 = arith.andi %51, %49 : vector<8x256xi1>
    %cst_49 = arith.constant 0.000000e+00 : f32
    %127 = vector.broadcast %cst_49 : f32 to vector<8x256xf32>
    %128 = arith.select %126, %125, %127 : vector<8x256xi1>, vector<8x256xf32>
    %129 = vector.extract_strided_slice %10 {offsets = [0, 2], sizes = [8, 1], strides = [1, 1]} : vector<8x9xf32> to vector<8x1xf32>
    %130 = vector.broadcast %129 : vector<8x1xf32> to vector<8x256xf32>
    %131 = arith.mulf %128, %130 : vector<8x256xf32>
    %132 = arith.addf %124, %131 : vector<8x256xf32>
    %c1_i32_50 = arith.constant 1 : i32
    %133 = tpu.dynamic_rotate %106 by %c1_i32_50 dim 1 : vector<8x256xf32>, i32 -> vector<8x256xf32>
    %cst_51 = arith.constant 0.000000e+00 : f32
    %134 = vector.broadcast %cst_51 : f32 to vector<8x256xf32>
    %135 = arith.select %47, %133, %134 : vector<8x256xi1>, vector<8x256xf32>
    %136 = vector.extract_strided_slice %10 {offsets = [0, 3], sizes = [8, 1], strides = [1, 1]} : vector<8x9xf32> to vector<8x1xf32>
    %137 = vector.broadcast %136 : vector<8x1xf32> to vector<8x256xf32>
    %138 = arith.mulf %135, %137 : vector<8x256xf32>
    %139 = arith.addf %132, %138 : vector<8x256xf32>
    %c255_i32 = arith.constant 255 : i32
    %140 = tpu.dynamic_rotate %106 by %c255_i32 dim 1 : vector<8x256xf32>, i32 -> vector<8x256xf32>
    %cst_52 = arith.constant 0.000000e+00 : f32
    %141 = vector.broadcast %cst_52 : f32 to vector<8x256xf32>
    %142 = arith.select %49, %140, %141 : vector<8x256xi1>, vector<8x256xf32>
    %143 = vector.extract_strided_slice %10 {offsets = [0, 5], sizes = [8, 1], strides = [1, 1]} : vector<8x9xf32> to vector<8x1xf32>
    %144 = vector.broadcast %143 : vector<8x1xf32> to vector<8x256xf32>
    %145 = arith.mulf %142, %144 : vector<8x256xf32>
    %146 = arith.addf %139, %145 : vector<8x256xf32>
    %c241_i32 = arith.constant 241 : i32
    %147 = tpu.dynamic_rotate %106 by %c241_i32 dim 1 : vector<8x256xf32>, i32 -> vector<8x256xf32>
    %148 = arith.andi %53, %47 : vector<8x256xi1>
    %cst_53 = arith.constant 0.000000e+00 : f32
    %149 = vector.broadcast %cst_53 : f32 to vector<8x256xf32>
    %150 = arith.select %148, %147, %149 : vector<8x256xi1>, vector<8x256xf32>
    %151 = vector.extract_strided_slice %10 {offsets = [0, 6], sizes = [8, 1], strides = [1, 1]} : vector<8x9xf32> to vector<8x1xf32>
    %152 = vector.broadcast %151 : vector<8x1xf32> to vector<8x256xf32>
    %153 = arith.mulf %150, %152 : vector<8x256xf32>
    %154 = arith.addf %146, %153 : vector<8x256xf32>
    %c240_i32_54 = arith.constant 240 : i32
    %155 = tpu.dynamic_rotate %106 by %c240_i32_54 dim 1 : vector<8x256xf32>, i32 -> vector<8x256xf32>
    %cst_55 = arith.constant 0.000000e+00 : f32
    %156 = vector.broadcast %cst_55 : f32 to vector<8x256xf32>
    %157 = arith.select %53, %155, %156 : vector<8x256xi1>, vector<8x256xf32>
    %158 = vector.extract_strided_slice %10 {offsets = [0, 7], sizes = [8, 1], strides = [1, 1]} : vector<8x9xf32> to vector<8x1xf32>
    %159 = vector.broadcast %158 : vector<8x1xf32> to vector<8x256xf32>
    %160 = arith.mulf %157, %159 : vector<8x256xf32>
    %161 = arith.addf %154, %160 : vector<8x256xf32>
    %c239_i32 = arith.constant 239 : i32
    %162 = tpu.dynamic_rotate %106 by %c239_i32 dim 1 : vector<8x256xf32>, i32 -> vector<8x256xf32>
    %163 = arith.andi %53, %49 : vector<8x256xi1>
    %cst_56 = arith.constant 0.000000e+00 : f32
    %164 = vector.broadcast %cst_56 : f32 to vector<8x256xf32>
    %165 = arith.select %163, %162, %164 : vector<8x256xi1>, vector<8x256xf32>
    %166 = vector.extract_strided_slice %10 {offsets = [0, 8], sizes = [8, 1], strides = [1, 1]} : vector<8x9xf32> to vector<8x1xf32>
    %167 = vector.broadcast %166 : vector<8x1xf32> to vector<8x256xf32>
    %168 = arith.mulf %165, %167 : vector<8x256xf32>
    %169 = arith.addf %161, %168 : vector<8x256xf32>
    %170 = vector.broadcast %12 : vector<8x1xf32> to vector<8x256xf32>
    %171 = arith.addf %169, %170 : vector<8x256xf32>
    %cst_57 = arith.constant 5.000000e-01 : f32
    %172 = vector.broadcast %cst_57 : f32 to vector<8x256xf32>
    %173 = arith.mulf %172, %171 : vector<8x256xf32>
    %cst_58 = arith.constant 0.707106769 : f32
    %174 = vector.broadcast %cst_58 : f32 to vector<8x256xf32>
    %175 = arith.mulf %171, %174 : vector<8x256xf32>
    %176 = math.erf %175 : vector<8x256xf32>
    %cst_59 = arith.constant 1.000000e+00 : f32
    %177 = vector.broadcast %cst_59 : f32 to vector<8x256xf32>
    %178 = arith.addf %177, %176 : vector<8x256xf32>
    %179 = arith.mulf %173, %178 : vector<8x256xf32>
    %180 = vector.extract_strided_slice %179 {offsets = [4, 0], sizes = [4, 256], strides = [1, 1]} : vector<8x256xf32> to vector<4x256xf32>
    %cst_60 = arith.constant dense<0.000000e+00> : vector<4xf32>
    %181 = vector.multi_reduction <add>, %180, %cst_60 [1] : vector<4x256xf32> to vector<4xf32>
    %182 = vector.shape_cast %181 : vector<4xf32> to vector<4x1xf32>
    %cst_61 = arith.constant 2.560000e+02 : f32
    %183 = vector.broadcast %cst_61 : f32 to vector<4x1xf32>
    %184 = arith.divf %182, %183 : vector<4x1xf32>
    %185 = vector.broadcast %184 : vector<4x1xf32> to vector<4x2xf32>
    %186 = arith.mulf %14, %185 : vector<4x2xf32>
    %cst_62 = arith.constant dense<0.000000e+00> : vector<2xf32>
    %187 = vector.multi_reduction <add>, %186, %cst_62 [0] : vector<4x2xf32> to vector<2xf32>
    %188 = vector.shape_cast %187 : vector<2xf32> to vector<1x2xf32>
    %189 = arith.addf %188, %17 : vector<1x2xf32>
    %cst_63 = arith.constant 0.000000e+00 : f32
    %190 = vector.broadcast %cst_63 : f32 to vector<1x2xf32>
    %191 = arith.maximumf %189, %190 : vector<1x2xf32>
    %192 = vector.broadcast %191 : vector<1x2xf32> to vector<4x2xf32>
    %193 = arith.mulf %15, %192 : vector<4x2xf32>
    %cst_64 = arith.constant dense<0.000000e+00> : vector<4xf32>
    %194 = vector.multi_reduction <add>, %193, %cst_64 [1] : vector<4x2xf32> to vector<4xf32>
    %195 = vector.shape_cast %194 : vector<4xf32> to vector<4x1xf32>
    %196 = arith.addf %195, %16 : vector<4x1xf32>
    %197 = arith.negf %196 : vector<4x1xf32>
    %198 = math.exp %197 : vector<4x1xf32>
    %cst_65 = arith.constant 1.000000e+00 : f32
    %199 = vector.broadcast %cst_65 : f32 to vector<4x1xf32>
    %200 = arith.addf %199, %198 : vector<4x1xf32>
    %201 = arith.divf %199, %200 : vector<4x1xf32>
    %202 = tpu.concatenate %201, %201 in 0 : vector<4x1xf32>, vector<4x1xf32> -> vector<8x1xf32>
    %203 = vector.broadcast %202 : vector<8x1xf32> to vector<8x256xf32>
    %204 = arith.mulf %179, %203 : vector<8x256xf32>
    %cst_66 = arith.constant dense<0.000000e+00> : vector<4x256xf32>
    %205 = tpu.matmul %25, %204, %cst_66 {dimension_numbers = #tpu.dot_dimension_numbers<[1], [0], [0], [1], [0, 0, 1, 1], [], []>} : vector<4x8xf32>, vector<8x256xf32>, vector<4x256xf32> -> vector<4x256xf32>
    %206 = vector.broadcast %7 : vector<4x1xf32> to vector<4x256xf32>
    %207 = arith.addf %205, %206 : vector<4x256xf32>
    %208 = arith.addf %57, %55 : vector<4x256xf32>
    %209 = vector.broadcast %8 : vector<4x1xf32> to vector<4x256xf32>
    %210 = arith.mulf %207, %209 : vector<4x256xf32>
    %211 = arith.addf %208, %210 : vector<4x256xf32>
    %cst_67 = arith.constant dense<0.000000e+00> : vector<256xf32>
    %212 = vector.multi_reduction <add>, %211, %cst_67 [0] : vector<4x256xf32> to vector<256xf32>
    %213 = vector.shape_cast %212 : vector<256xf32> to vector<1x256xf32>
    %cst_68 = arith.constant 4.000000e+00 : f32
    %214 = vector.broadcast %cst_68 : f32 to vector<1x256xf32>
    %215 = arith.divf %213, %214 : vector<1x256xf32>
    %216 = vector.broadcast %215 : vector<1x256xf32> to vector<4x256xf32>
    %217 = arith.subf %211, %216 : vector<4x256xf32>
    %218 = arith.mulf %217, %217 : vector<4x256xf32>
    %cst_69 = arith.constant dense<0.000000e+00> : vector<256xf32>
    %219 = vector.multi_reduction <add>, %218, %cst_69 [0] : vector<4x256xf32> to vector<256xf32>
    %220 = vector.shape_cast %219 : vector<256xf32> to vector<1x256xf32>
    %cst_70 = arith.constant 4.000000e+00 : f32
    %221 = vector.broadcast %cst_70 : f32 to vector<1x256xf32>
    %222 = arith.divf %220, %221 : vector<1x256xf32>
    %223 = vector.broadcast %215 : vector<1x256xf32> to vector<4x256xf32>
    %224 = arith.subf %211, %223 : vector<4x256xf32>
    %cst_71 = arith.constant 9.99999997E-7 : f32
    %225 = vector.broadcast %cst_71 : f32 to vector<1x256xf32>
    %226 = arith.addf %222, %225 : vector<1x256xf32>
    %227 = math.rsqrt %226 : vector<1x256xf32>
    %228 = vector.broadcast %227 : vector<1x256xf32> to vector<4x256xf32>
    %229 = arith.mulf %224, %228 : vector<4x256xf32>
    %230 = vector.broadcast %5 : vector<4x1xf32> to vector<4x256xf32>
    %231 = arith.mulf %229, %230 : vector<4x256xf32>
    %232 = vector.broadcast %6 : vector<4x1xf32> to vector<4x256xf32>
    %233 = arith.addf %231, %232 : vector<4x256xf32>
    %cst_72 = arith.constant dense<0.000000e+00> : vector<8x256xf32>
    %234 = tpu.matmul %26, %233, %cst_72 {dimension_numbers = #tpu.dot_dimension_numbers<[1], [0], [0], [1], [0, 0, 1, 1], [], []>} : vector<8x4xf32>, vector<4x256xf32>, vector<8x256xf32> -> vector<8x256xf32>
    %235 = vector.broadcast %22 : vector<8x1xf32> to vector<8x256xf32>
    %236 = arith.addf %234, %235 : vector<8x256xf32>
    %cst_73 = arith.constant 5.000000e-01 : f32
    %237 = vector.broadcast %cst_73 : f32 to vector<8x256xf32>
    %238 = arith.mulf %237, %236 : vector<8x256xf32>
    %cst_74 = arith.constant 0.707106769 : f32
    %239 = vector.broadcast %cst_74 : f32 to vector<8x256xf32>
    %240 = arith.mulf %236, %239 : vector<8x256xf32>
    %241 = math.erf %240 : vector<8x256xf32>
    %cst_75 = arith.constant 1.000000e+00 : f32
    %242 = vector.broadcast %cst_75 : f32 to vector<8x256xf32>
    %243 = arith.addf %242, %241 : vector<8x256xf32>
    %244 = arith.mulf %238, %243 : vector<8x256xf32>
    %cst_76 = arith.constant dense<0.000000e+00> : vector<8x256xf32>
    %245 = tpu.matmul %27, %244, %cst_76 {dimension_numbers = #tpu.dot_dimension_numbers<[1], [0], [0], [1], [0, 0, 1, 1], [], []>} : vector<8x8xf32>, vector<8x256xf32>, vector<8x256xf32> -> vector<8x256xf32>
    %246 = vector.broadcast %19 : vector<8x1xf32> to vector<8x256xf32>
    %247 = arith.addf %245, %246 : vector<8x256xf32>
    %cst_77 = arith.constant dense<0.000000e+00> : vector<8x256xf32>
    %248 = tpu.matmul %28, %211, %cst_77 {dimension_numbers = #tpu.dot_dimension_numbers<[1], [0], [0], [1], [0, 0, 1, 1], [], []>} : vector<8x4xf32>, vector<4x256xf32>, vector<8x256xf32> -> vector<8x256xf32>
    %249 = vector.broadcast %20 : vector<8x1xf32> to vector<8x256xf32>
    %250 = arith.addf %248, %249 : vector<8x256xf32>
    %251 = vector.broadcast %21 : vector<8x1xf32> to vector<8x256xf32>
    %252 = arith.mulf %247, %251 : vector<8x256xf32>
    %253 = arith.addf %250, %252 : vector<8x256xf32>
    %c0_78 = arith.constant 0 : index
    %c0_79 = arith.constant 0 : index
    %c0_80 = arith.constant 0 : index
    %254 = vector.load %arg15[%c0_78, %c0_79, %c0_80] : memref<1x8x256xf32, #tpu.memory_space<vmem>>, vector<1x8x256xf32>
    %255 = vector.shape_cast %254 : vector<1x8x256xf32> to vector<8x256xf32>
    %256 = vector.shape_cast %253 : vector<8x256xf32> to vector<1x8x256xf32>
    tpu.vector_store %arg15[%c0_78, %c0_79, %c0_80], %256 {strides = array<i32>} : memref<1x8x256xf32, #tpu.memory_space<vmem>>, vector<1x8x256xf32>,
    return
  }
  func.func @transform_0(%arg0: i32) -> (i32, i32, i32) {
    %c0_i32 = arith.constant 0 : i32
    %c0_i32_0 = arith.constant 0 : i32
    %c0_i32_1 = arith.constant 0 : i32
    return %arg0, %c0_i32, %c0_i32_0 : i32, i32, i32
  }
  func.func @transform_1(%arg0: i32) -> (i32, i32, i32) {
    %c0_i32 = arith.constant 0 : i32
    %c0_i32_0 = arith.constant 0 : i32
    %c0_i32_1 = arith.constant 0 : i32
    return %arg0, %c0_i32, %c0_i32_0 : i32, i32, i32
  }
  func.func @transform_2(%arg0: i32) -> (i32, i32) {
    %c0_i32 = arith.constant 0 : i32
    %c0_i32_0 = arith.constant 0 : i32
    %c0_i32_1 = arith.constant 0 : i32
    return %c0_i32, %c0_i32_0 : i32, i32
  }
  func.func @transform_3(%arg0: i32) -> (i32, i32) {
    %c0_i32 = arith.constant 0 : i32
    %c0_i32_0 = arith.constant 0 : i32
    %c0_i32_1 = arith.constant 0 : i32
    return %c0_i32, %c0_i32_0 : i32, i32
  }
  func.func @transform_4(%arg0: i32) -> (i32, i32) {
    %c0_i32 = arith.constant 0 : i32
    %c0_i32_0 = arith.constant 0 : i32
    %c0_i32_1 = arith.constant 0 : i32
    return %c0_i32, %c0_i32_0 : i32, i32
  }
  func.func @transform_5(%arg0: i32) -> (i32, i32) {
    %c0_i32 = arith.constant 0 : i32
    %c0_i32_0 = arith.constant 0 : i32
    %c0_i32_1 = arith.constant 0 : i32
    return %c0_i32, %c0_i32_0 : i32, i32
  }
  func.func @transform_6(%arg0: i32) -> (i32, i32) {
    %c0_i32 = arith.constant 0 : i32
    %c0_i32_0 = arith.constant 0 : i32
    %c0_i32_1 = arith.constant 0 : i32
    return %c0_i32, %c0_i32_0 : i32, i32
  }
  func.func @transform_7(%arg0: i32) -> (i32, i32) {
    %c0_i32 = arith.constant 0 : i32
    %c0_i32_0 = arith.constant 0 : i32
    %c0_i32_1 = arith.constant 0 : i32
    return %c0_i32, %c0_i32_0 : i32, i32
  }
  func.func @transform_8(%arg0: i32) -> (i32, i32) {
    %c0_i32 = arith.constant 0 : i32
    %c0_i32_0 = arith.constant 0 : i32
    %c0_i32_1 = arith.constant 0 : i32
    return %c0_i32, %c0_i32_0 : i32, i32
  }
  func.func @transform_9(%arg0: i32) -> (i32, i32) {
    %c0_i32 = arith.constant 0 : i32
    %c0_i32_0 = arith.constant 0 : i32
    %c0_i32_1 = arith.constant 0 : i32
    return %c0_i32, %c0_i32_0 : i32, i32
  }
  func.func @transform_10(%arg0: i32) -> (i32, i32) {
    %c0_i32 = arith.constant 0 : i32
    %c0_i32_0 = arith.constant 0 : i32
    %c0_i32_1 = arith.constant 0 : i32
    return %c0_i32, %c0_i32_0 : i32, i32
  }
  func.func @transform_11(%arg0: i32) -> (i32, i32) {
    %c0_i32 = arith.constant 0 : i32
    %c0_i32_0 = arith.constant 0 : i32
    %c0_i32_1 = arith.constant 0 : i32
    return %c0_i32, %c0_i32_0 : i32, i32
  }
  func.func @transform_12(%arg0: i32) -> (i32, i32) {
    %c0_i32 = arith.constant 0 : i32
    %c0_i32_0 = arith.constant 0 : i32
    %c0_i32_1 = arith.constant 0 : i32
    return %c0_i32, %c0_i32_0 : i32, i32
  }
  func.func @transform_13(%arg0: i32) -> (i32, i32) {
    %c0_i32 = arith.constant 0 : i32
    %c0_i32_0 = arith.constant 0 : i32
    %c0_i32_1 = arith.constant 0 : i32
    return %c0_i32, %c0_i32_0 : i32, i32
  }
  func.func @transform_14(%arg0: i32) -> (i32, i32, i32) {
    %c0_i32 = arith.constant 0 : i32
    %c0_i32_0 = arith.constant 0 : i32
    %c0_i32_1 = arith.constant 0 : i32
    return %arg0, %c0_i32, %c0_i32_0 : i32, i32, i32
  }
}

</mosaic_0001>

<bundles_post_ra>
// kernel: tpu_custom_call.1
= control target key start
LH: loop header
LB: loop body
LE: loop exit
PB: predicated region body
PF: predicated region fallthrough
CT: control target
= control target key end

     0   :  { %s2533_s0 = inlined_call_operand.vmem [shape: f32[2,4,256], index: 0, kind: input, shape index: {}]   ;;  %s2534_s1 = inlined_call_operand.vmem [shape: f32[2,4,256], index: 1, kind: input, shape index: {}]   ;;  %s2535_s2 = inlined_call_operand.hbm [shape: f32[4,4], index: 2, kind: input, shape index: {}]   ;;  %s2536_s3 = inlined_call_operand.hbm [shape: f32[4,4], index: 3, kind: input, shape index: {}]   ;;  %s2537_s4 = inlined_call_operand.hbm [shape: f32[4,8], index: 4, kind: input, shape index: {}]   ;;  %s2538_s5 = inlined_call_operand.vmem [shape: f32[8,4], index: 5, kind: input, shape index: {}]   ;;  %s2539_s6 = inlined_call_operand.vmem [shape: f32[8,1], index: 6, kind: input, shape index: {}]   ;;  %s2540_s7 = inlined_call_operand.vmem [shape: f32[8,8], index: 7, kind: input, shape index: {}]   ;;  %s2541_s8 = inlined_call_operand.vmem [shape: f32[8,4], index: 8, kind: input, shape index: {}]   ;;  %s2542_s9 = inlined_call_operand.vmem [shape: f32[4,8], index: 9, kind: input, shape index: {}]   ;;  %s2543_s10 = inlined_call_operand.vmem [shape: f32[8,11], index: 10, kind: input, shape index: {}]   ;;  %s2544_s11 = inlined_call_operand.vmem [shape: f32[4,5], index: 11, kind: input, shape index: {}]   ;;  %s2545_s12 = inlined_call_operand.vmem [shape: f32[1,2], index: 12, kind: input, shape index: {}]   ;;  %s2546_s13 = inlined_call_operand.vmem [shape: f32[8,3], index: 13, kind: input, shape index: {}]   ;;  %s2547_s14 = inlined_call_operand.hbm [shape: f32[2,8,256], index: 14, kind: output, shape index: {}]  }
   0x1   :  { %2560 = sst [smem:[#allocation19_spill]] %s2547_s14 }
   0x2   :  { %19 = vsyncpa [#allocation3], 0 }
   0x3   :  { %20 = vsyncpa [#allocation6], 0 }
   0x4   :  { %21 = vsyncpa [#allocation4], 0 }
   0x5   :  { %23 = vsyncpa [#allocation4 + $0x1], 0  ;;  %s2119_s29 = smov 0   ;;  %s2121_s30 = smov 0  }
   0x6   :  { %s2123_s15 = smov 0   ;;  %s2125_s16 = smov 0  }
   0x7 LB: > { %2561 = sst [smem:[#allocation12_spill]] %s2003_s29  ;;  %s2140_s17 = sadd.s32 4294967295, %s2015_s16   ;;  %s2015_s16 = sphi %s2125_s16, %s2593_s16   ;;  %s2011_s15 = sphi %s2123_s15, %s2595_s15   ;;  %s2007_s30 = sphi %s2121_s30, %s2597_s30   ;;  %s2003_s29 = sphi %s2119_s29, %s2596_s29  }
   0x8   : > { %2562 = sst [smem:[#allocation13_spill]] %s2011_s15  ;;  %s1679_s18 = sadd.s32 4294967294, %s2015_s16  }
   0x9   : > { %2563 = sst [smem:[#allocation14_spill]] %s2015_s16  ;;  %s2144_s19 = sadd.s32 1, %s2015_s16  }
   0xa   : > { %2564 = sst [smem:[#allocation15_spill]] %s2144_s19  ;;  %s340_s20 = sadd.s32 1, %s2011_s15 }
   0xb   : > { %s337_s21 = ssub.s32 %s2015_s16, %s2144_s19  ;;  %p350_p0 = scmp.ne.s32.totalorder %s2011_s15, %s2007_s30 }
   0xc   : > { %p338_p1 = scmp.eq.s32.totalorder %s337_s21, 0  ;;  %p351_p2 = scmp.eq.s32.totalorder %s2140_s17, 1 }
   0xd   : > { %p356_p3 = scmp.ne.s32.totalorder %s2007_s30, %s2003_s29  ;;  %p357_p4 = scmp.eq.s32.totalorder %s1679_s18, 1 }
   0xe   : > { %s2155_s22 = scalar_select %p338_p1, %s2011_s15, %s340_s20  }
   0xf   : > { %p2157_p5 = por %p351_p2, %p350_p0  ;;  %p2161_p6 = por %p357_p4, %p356_p3 }
  0x10   : > { %2565 = sst [smem:[#allocation16_spill]] %s2155_s22  ;;  %p1680_p7 = scmp.ge.s32.totalorder %s2015_s16, 1 }
  0x11   : > { %s2566_s23 = scalar_select %p2157_p5, 1, 0 }
  0x12   : > { %s2568_s24 = scalar_select %p2161_p6, 1, 0 }
  0x13   : > { %2567 = sst [smem:[#allocation17_spill]] %s2566_s23  ;;  %p364_p8 = scmp.lt.s32.totalorder %s2015_s16, 3 }
  0x14   : > { %2569 = sst [smem:[#allocation18_spill]] %s2568_s24  ;;  %p2554_p9 = scmp.eq.s32.totalorder %s2140_s17, 0 }
  0x15   : > { %p2168_p10 = pnand %p1680_p7, %p364_p8  ;;  %s2017_s26 = smov [#allocation5]  }
  0x16   : > { %s388_s27 = sshll.u32 %s2017_s26, 4  ;;  %s2018_s28 = smov [#allocation2]   ;;  %s389_s27 = int_to_ptr.vmem [resolvable:$true] %s388_s27 }
  0x17   : > { %s2570_s25 = scalar_select %p2168_p10, 1, 0 }
  0x18   : > { %p1731_p11 = pneg %p2168_p10  ;;  %s377_s18 = sshll.u32 %s2018_s28, 4  ;;  %s2180_s18 = int_to_ptr.vmem [resolvable:$true] %s377_s18 }
  0x19   : > { %s2019_s21 = smov [#allocation7]   ;;  %s1861_s26 = scalar_lea.hbm %s2536_s3, 64 }
  0x1a   : > { %p2176_p12 = pnand %p2554_p9, %p1731_p11  ;;  %s399_s22 = sshll.u32 %s2019_s21, 4  ;;  %s2182_s22 = int_to_ptr.vmem [resolvable:$true] %s399_s22 }
  0x1b   : > { %p1862_p13 = scmp.ne.s32.totalorder %s2536_s3, %s1861_s26  ;;  %p1868_p3 = scmp.lt.u32.totalorder %s1861_s26, %s2536_s3 }
  0x1c   : > { %p2192_p0 = pneg %p2176_p12 }
  0x1e   : > { %p1864_p1 = pnand %p2192_p0, %p1862_p13 }
  0x20   : > { %p1865_p2 = pneg %p1864_p1 }
  0x22   : > { %p1870_p4 = pnand %p1868_p3, %p1865_p2 }
  0x24   : > { %1873 = shalt.err (!%p1870_p4)
}
  0x25   : > { %s1874_s15 = scalar_lea.vmem %s389_s27, 64  ;;  %p1882_p9 = scmp.lt.s32.totalorder %s389_s27, %s389_s27 }
  0x26   : > { %p1875_p7 = scmp.ne.s32.totalorder %s389_s27, %s1874_s15  ;;  %p1883_p6 = scmp.lt.s32.totalorder %s1874_s15, %s1874_s15 }
  0x28   : > { %p1877_p8 = pnand %p1875_p7, %p2192_p0  ;;  %p1884_p5 = por %p1883_p6, %p1882_p9 }
  0x2a   : > { %p1878_p11 = pneg %p1877_p8 }
  0x2c   : > { %p1885_p10 = pnand %p1884_p5, %p1878_p11 }
  0x2e   : > { %1888 = shalt.err (!%p1885_p10)
}
  0x2f   : > { %1737 = dma.hbm_to_vmem [thread:$0]  (!%p2176_p12), %s2536_s3, 64, %s389_s27, [#allocation6]  }
  0x30   : > { %s1889_s26 = scalar_lea.hbm %s2535_s2, 64 }
  0x31   : > { %p1890_p13 = scmp.ne.s32.totalorder %s2535_s2, %s1889_s26  ;;  %p1896_p5 = scmp.lt.u32.totalorder %s1889_s26, %s2535_s2 }
  0x33   : > { %p1892_p1 = pnand %p1890_p13, %p2192_p0 }
  0x35   : > { %p1893_p6 = pneg %p1892_p1 }
  0x37   : > { %p1898_p9 = pnand %p1896_p5, %p1893_p6 }
  0x39   : > { %1901 = shalt.err (!%p1898_p9)
}
  0x3a   : > { %s1902_s27 = scalar_lea.vmem %s2180_s18, 64  ;;  %p1910_p4 = scmp.lt.s32.totalorder %s2180_s18, %s2180_s18 }
  0x3b   : > { %p1903_p10 = scmp.ne.s32.totalorder %s2180_s18, %s1902_s27  ;;  %p1911_p7 = scmp.lt.s32.totalorder %s1902_s27, %s1902_s27 }
  0x3d   : > { %p1905_p2 = pnand %p1903_p10, %p2192_p0  ;;  %p1912_p8 = por %p1911_p7, %p1910_p4 }
  0x3f   : > { %p1906_p3 = pneg %p1905_p2 }
  0x41   : > { %p1913_p11 = pnand %p1912_p8, %p1906_p3 }
  0x43   : > { %1916 = shalt.err (!%p1913_p11)
}
  0x44   : > { %1734 = dma.hbm_to_vmem [thread:$0]  (!%p2176_p12), %s2535_s2, 64, %s2180_s18, [#allocation3]  }
  0x45   : > { %s1917_s16 = scalar_lea.hbm %s2537_s4, 64 }
  0x46   : > { %p1918_p13 = scmp.ne.s32.totalorder %s2537_s4, %s1917_s16  ;;  %p1924_p5 = scmp.lt.u32.totalorder %s1917_s16, %s2537_s4 }
  0x48   : > { %p1920_p1 = pnand %p1918_p13, %p2192_p0 }
  0x4a   : > { %p1921_p6 = pneg %p1920_p1 }
  0x4c   : > { %p1926_p9 = pnand %p1924_p5, %p1921_p6 }
  0x4e   : > { %1929 = shalt.err (!%p1926_p9)
}
  0x4f   : > { %s1930_s18 = scalar_lea.vmem %s2182_s22, 64  ;;  %p1938_p4 = scmp.lt.s32.totalorder %s2182_s22, %s2182_s22 }
  0x50   : > { %p1931_p10 = scmp.ne.s32.totalorder %s2182_s22, %s1930_s18  ;;  %p1939_p7 = scmp.lt.s32.totalorder %s1930_s18, %s1930_s18 }
  0x52   : > { %p1933_p2 = pnand %p1931_p10, %p2192_p0  ;;  %p1940_p8 = por %p1939_p7, %p1938_p4 }
  0x54   : > { %p1934_p3 = pneg %p1933_p2 }
  0x56   : > { %p1941_p11 = pnand %p1940_p8, %p1934_p3 }
  0x58   : > { %1944 = shalt.err (!%p1941_p11)
}
  0x59   : > { %1740 = dma.hbm_to_vmem [thread:$0]  (!%p2176_p12), %s2537_s4, 64, %s2182_s22, [#allocation6]  }
  0x5a   : > { %p2573_p13 = scmp.ne.s32.totalorder %s2570_s25, 0 }
  0x5b   : > { %p2574_p1 = scmp.eq.s32.totalorder (!%p2573_p13), %s2140_s17, 0 }
  0x5c   : > { %455 = sbr.rel (%p2573_p13) target bundleno = 2122 (0x84a), region = 76 }
  0x63   : > { %1990 = dma.done.wait (%p2574_p1), [#allocation3], 64   ;;  %p2575_p0 = pmov %p2574_p1 }
  0x65   : > { %1992 = vsyncadd (%p2575_p0), [#allocation3], 4294967232  ;;  %p2576_p6 = pmov %p2575_p0 }
  0x66   : > { %p2577_p5 = pmov %p2575_p0 }
  0x67   : > { %1994 = dma.done.wait (%p2576_p6), [#allocation6], 128  }
  0x68   : > { %1996 = vsyncadd (%p2577_p5), [#allocation6], 4294967168  ;;  %v2020_v0 = vmov 2   ;;  %v2021_v1 = vmov 3   ;;  %v2268_v2 = vld [vmem:[%s2542_s9] sm:$0xf] }
  0x69   : > { %1810 = vset.pattern.permute.xlu0 %v2020_v0  ;;  %1812 = vset.pattern.permute.xlu1 %v2021_v1  ;;  %v2022_v3 = vmov 0   ;;  %v2023_v4 = vmov 1   ;;  %p514_p12 = scmp.lt.s32.totalorder %s2140_s17, 1  ;;  %v2024_v5 = vmov 0.0   ;;  %v2283_v6 = vld [vmem:[%s2543_s10] sm:$0xff]  ;;  %v2025_v7 = vmov 9  }
  0x6a   : > { %707 = vperm.xlu0 %1810, %v2268_v2   ;;  %719 = vperm.xlu1 %1812, %v2268_v2   ;;  %v2026_v8 = vmov 4   ;;  %vm576_vm0 = vcmask 1043456   ;;  %v2027_v17 = vmov 5   ;;  %v2028_v18 = vmov 6   ;;  %s2033_s18 = smov 112   ;;  %s2034_s27 = smov 17  }
  0x6b   : > { %s515_s20 = scalar_select %p514_p12, %s2140_s17, 1  ;;  %884 = vmatprep.mubr.f32.mxu1 %v2024_v5  ;;  %804 = vmatprep.mubr.f32.mxu0 %v2024_v5  ;;  %v2029_v29 = vmov 7   ;;  %v2030_v36 = vmov 8   ;;  %vm732_vm1 = vcmask 31744  }
  0x6c   : > { %s2035_s14 = smov 16   ;;  %s2036_s22 = smov 15  }
  0x6d   : > { %s1714_s28 = sshll.u32 %s515_s20, 3  ;;  %s2037_s25 = smov 1  }
  0x6e   : > { %1811 = vset.pattern.permute.xlu0 %v2022_v3  ;;  %1813 = vset.pattern.permute.xlu1 %v2023_v4  ;;  %s523_s24 = scalar_lea.vmem %s2534_s1, %s1714_s28  ;;  %s518_s15 = scalar_lea.vmem %s2533_s0, %s1714_s28 }
  0x6f   : > { %630 = vperm.xlu0 %1811, %v2268_v2   ;;  %642 = vperm.xlu1 %1813, %v2268_v2   ;;  %v2291_v9 = vld [vmem:[%s523_s24] sm:$0xff]  ;;  %s2038_s20 = smov 127   ;;  %s2039_s28 = smov 113  }
  0x70   : > { %v654_v10 = vcombine.high %v2291_v9, %v2291_v9  ;;  %v2302_v11 = vld [vmem:[%s518_s15] sm:$0xff]  ;;  %v656_v12 = vsel %vm576_vm0, %v2291_v9, 0.0  ;;  %s2040_s23 = smov 111   ;;  %s2041_s26 = smov 2  }
  0x71   : > { %v574_v14 = vcombine.high %v2302_v11, %v2302_v11  ;;  %v657_v15 = vrot.slane %v656_v12, 4  ;;  %v577_v19 = vsel %vm576_vm0, %v2302_v11, 0.0  ;;  %s2042_s21 = smov 126   ;;  %s511_s19 = sand.u32 1, %s2007_s30  }
  0x72   : > { %v663_v13 = vsel %vm576_vm0, %v654_v10, 0.0  ;;  %v578_v23 = vrot.slane %v577_v19, 4  ;;  %s1689_s16 = sshll.u32 %s511_s19, 4  ;;  %s2586_s24 = sld [smem:[#allocation17_spill]] }
  0x73   : > { %1814 = vset.pattern.permute.xlu1 %v2025_v7  ;;  %1815 = vset.pattern.permute.xlu0 %v2026_v8  ;;  %v664_v16 = vrot.slane %v663_v13, 4  ;;  %v584_v20 = vsel %vm576_vm0, %v574_v14, 0.0  ;;  %v658_v21 = vadd.f32 %v657_v15, %v656_v12 }
  0x74   : > { %901 = vperm.xlu1 %1814, %v2283_v6   ;;  %907 = vperm.xlu0 %1815, %v2283_v6   ;;  %v585_v24 = vrot.slane %v584_v20, 4  ;;  %v579_v27 = vadd.f32 %v578_v23, %v577_v19 }
  0x75   : > { %v665_v22 = vadd.f32 %v664_v16, %v663_v13  ;;  %v659_v25 = vrot.slane %v658_v21, 2 }
  0x76   : > { %v586_v28 = vadd.f32 %v585_v24, %v584_v20  ;;  %v580_v32 = vrot.slane %v579_v27, 2 }
  0x77   : > { %v666_v26 = vrot.slane %v665_v22, 2  ;;  %v660_v30 = vadd.f32 %v659_v25, %v658_v21 }
  0x78   : > { %1818 = vset.pattern.permute.xlu0 %v2020_v0  ;;  %1816 = vset.pattern.permute.xlu1 %v2022_v3  ;;  %v587_v33 = vrot.slane %v586_v28, 2  ;;  %v581_v37 = vadd.f32 %v580_v32, %v579_v27  ;;  %p2588_p10 = scmp.ne.s32.totalorder %s2586_s24, 0 }
  0x79   : > { %960 = vperm.xlu0 %1818, %v2283_v6   ;;  %924 = vperm.xlu1 %1816, %v2283_v6   ;;  %v667_v31 = vadd.f32 %v666_v26, %v665_v22  ;;  %v661_v34 = vrot.slane %v660_v30, 1 }
  0x7a   : > { %v588_v38 = vadd.f32 %v587_v33, %v586_v28  ;;  %v582_v41 = vrot.slane %v581_v37, 1 }
  0x7b   : > { %v668_v35 = vrot.slane %v667_v31, 1  ;;  %v662_v39 = vadd.f32 %v661_v34, %v660_v30 }
  0x7c   : > { %v589_v42 = vrot.slane %v588_v38, 1  ;;  %v583_v45 = vadd.f32 %v582_v41, %v581_v37  ;;  %v2031_v41 = vmov 839922192  }
  0x7d   : > { %1819 = vset.pattern.permute.xlu0 %v2021_v1  ;;  %1817 = vset.pattern.permute.xlu1 %v2023_v4  ;;  %v669_v40 = vadd.f32 %v668_v35, %v667_v31  ;;  %v670_v43 = vmul.f32 0.25, %v662_v39 }
  0x7e   : > { %977 = vperm.xlu0 %1819, %v2283_v6   ;;  %941 = vperm.xlu1 %1817, %v2283_v6   ;;  %v590_v46 = vadd.f32 %v589_v42, %v588_v38  ;;  %v592_v48 = vmul.f32 0.25, %v583_v45  ;;  %v633_v42 = vunpack.c.l.s4 %v2031_v41 }
  0x7f   : > { %v671_v44 = vmul.f32 0.25, %v669_v40  ;;  %v536_v40 = vlaneseq }
  0x80   : > { %v593_v49 = vmul.f32 0.25, %v590_v46  ;;  %v634_v45 = vunpack.c.0.s8 %v633_v42 }
  0x81   : > { %v674_v47 = vcombine.low %v670_v43, %v671_v44  ;;  %v2328_v46 = vshrl.u32 %v536_v40, 7 }
  0x82   : > { %1820 = vset.pattern.permute.xlu0 %v2027_v17  ;;  %1826 = vset.pattern.permute.xlu1 %v2028_v18  ;;  %v596_v51 = vcombine.low %v592_v48, %v593_v49 }
  0x83   : > { %994 = vperm.xlu0 %1820, %v2283_v6   ;;  %v676_v50 = vsub.f32 %v2291_v9, %v674_v47 }
  0x84   : > { %v598_v53 = vsub.f32 %v2302_v11, %v596_v51  ;;  %v2331_v51 = vsub.s32 %v634_v45, %v2328_v46 }
  0x85   : > { %v677_v52 = vmul.f32 %v676_v50, %v676_v50 }
  0x86   : > { %v599_v55 = vmul.f32 %v598_v53, %v598_v53 }
  0x87   : > { %1821 = vset.pattern.permute.xlu0 %v2028_v18  ;;  %v679_v54 = vcombine.high %v677_v52, %v677_v52  ;;  %v681_v56 = vsel %vm576_vm0, %v677_v52, 0.0 }
  0x88   : > { %1013 = vperm.xlu0 %1821, %v2283_v6   ;;  %v601_v58 = vcombine.high %v599_v55, %v599_v55  ;;  %v682_v59 = vrot.slane %v681_v56, 4  ;;  %v603_v61 = vsel %vm576_vm0, %v599_v55, 0.0 }
  0x89   : > { %v688_v57 = vsel %vm576_vm0, %v679_v54, 0.0  ;;  %v604_v7 = vrot.slane %v603_v61, 4 }
  0x8a   : > { %v689_v60 = vrot.slane %v688_v57, 4  ;;  %v610_v62 = vsel %vm576_vm0, %v601_v58, 0.0  ;;  %v683_v63 = vadd.f32 %v682_v59, %v681_v56 }
  0x8b   : > { %v611_v10 = vrot.slane %v610_v62, 4  ;;  %v605_v14 = vadd.f32 %v604_v7, %v603_v61 }
  0x8c   : > { %1822 = vset.pattern.permute.xlu0 %v2029_v29  ;;  %v690_v1 = vadd.f32 %v689_v60, %v688_v57  ;;  %v684_v12 = vrot.slane %v683_v63, 2 }
  0x8d   : > { %1030 = vperm.xlu0 %1822, %v2283_v6   ;;  %v612_v15 = vadd.f32 %v611_v10, %v610_v62  ;;  %v606_v19 = vrot.slane %v605_v14, 2 }
  0x8e   : > { %v691_v13 = vrot.slane %v690_v1, 2  ;;  %v685_v16 = vadd.f32 %v684_v12, %v683_v63 }
  0x8f   : > { %v613_v20 = vrot.slane %v612_v15, 2  ;;  %v607_v23 = vadd.f32 %v606_v19, %v605_v14 }
  0x90   : > { %v692_v18 = vadd.f32 %v691_v13, %v690_v1  ;;  %v686_v21 = vrot.slane %v685_v16, 1  ;;  %v531_v13 = vld [vmem:[#allocation5] sm:$0xf] }
  0x91   : > { %1823 = vset.pattern.permute.xlu0 %v2030_v36  ;;  %v614_v24 = vadd.f32 %v613_v20, %v612_v15  ;;  %v608_v27 = vrot.slane %v607_v23, 1  ;;  %v2032_v15 = vmov 10  }
  0x92   : > { %1049 = vperm.xlu0 %1823, %v2283_v6   ;;  %v693_v22 = vrot.slane %v692_v18, 1  ;;  %v687_v25 = vadd.f32 %v686_v21, %v685_v16 }
  0x93   : > { %v615_v28 = vrot.slane %v614_v24, 1  ;;  %v609_v32 = vadd.f32 %v608_v27, %v607_v23 }
  0x94   : > { %v694_v26 = vadd.f32 %v693_v22, %v692_v18  ;;  %v695_v30 = vmul.f32 0.25, %v687_v25 }
  0x95   : > { %v616_v33 = vadd.f32 %v615_v28, %v614_v24  ;;  %v617_v36 = vmul.f32 0.25, %v609_v32 }
  0x96   : > { %v696_v31 = vmul.f32 0.25, %v694_v26  ;;  %v697_v34 = vadd.f32 1e-06, %v695_v30  ;;  %1824 = vset.pattern.permute.xlu0 %v2032_v15 }
  0x97   : > { %v618_v37 = vmul.f32 0.25, %v616_v33  ;;  %v619_v38 = vadd.f32 1e-06, %v617_v36 }
  0x98   : > { %v698_v35 = vadd.f32 1e-06, %v696_v31  ;;  %1837 = vrsqrt.f32 %v697_v34 }
  0x99   : > { %v620_v39 = vadd.f32 1e-06, %v618_v37 }
  0x9a   : > { %1839 = vrsqrt.f32 %v698_v35  ;;  %v2350_v35 = vand.u32 127, %v536_v40 }
  0x9b   : > { %1841 = vrsqrt.f32 %v619_v38 }
  0x9c   : > { %1843 = vrsqrt.f32 %v620_v39  ;;  %v2355_v38 = vadd.s32 128, %v2350_v35  ;;  %v543_v41 = vand.u32 15, %v2350_v35  ;;  %vm567_vm3 = vcmp.ge.s32.totalorder %v2350_v35, 16 }
  0x9d   : > { %vm916_vm4 = vcmp.lt.s32.totalorder %v2350_v35, 17  ;;  %vm935_vm7 = vcmp.lt.s32.totalorder %v2350_v35, 16  ;;  %vm952_vm9 = vcmp.lt.s32.totalorder %v2350_v35, 15  ;;  %vm971_vm12 = vcmp.lt.s32.totalorder %v2350_v35, 1 }
  0x9e   : > { %vm2363_vm2 = vcmp.gt.s32.totalorder %v543_v41, 0  ;;  %vm2380_vm8 = vcmp.lt.s32.totalorder %v543_v41, 15  ;;  %vm988_vm13 = vcmp.lt.s32.totalorder %v2350_v35, 127  ;;  %vm570_vm14 = vcmp.lt.s32.totalorder %v2355_v38, 240 }
  0x9f   : > { %vm919_vm6 = vmand %vm567_vm3, %vm2363_vm2  ;;  %vm1005_vm15 = vcmp.lt.s32.totalorder %v2350_v35, 113 }
  0xa0   : > { %vm955_vm11 = vmand %vm567_vm3, %vm2380_vm8 }
  0xa2   : > { %v1838_v43 = vpop.eup %1837 }
  0xa4   : > { %v1840_v44 = vpop.eup %1839 }
  0xa5   : > { %v703_v47 = vcombine.low %v1838_v43, %v1840_v44  ;;  %v1842_v48 = vpop.eup %1841  ;;  %v550_v43 = vand.u32 15, %v2355_v38 }
  0xa6   : > { %v1844_v49 = vpop.eup %1843 }
  0xa7   : > { %v705_v52 = vmul.f32 %v703_v47, %v676_v50  ;;  %v625_v56 = vcombine.low %v1842_v48, %v1844_v49  ;;  %vm2369_vm5 = vcmp.gt.s32.totalorder %v550_v43, 0  ;;  %vm2387_vm10 = vcmp.lt.s32.totalorder %v550_v43, 15 }
  0xa9   : > { %v627_v60 = vmul.f32 %v625_v56, %v598_v53  ;;  %v530_v53 = vld [vmem:[#allocation2] sm:$0xf] }
  0xe9   : > { %v708_v54 = vpop.permute.xlu0 %707  ;;  %v720_v55 = vpop.permute.xlu1 %719 }
  0xea   : > { %v715_v57 = vrot.slane %v708_v54, %v2331_v51  ;;  %v727_v58 = vrot.slane %v720_v55, %v2331_v51 }
  0xec   : > { %v717_v59 = vmul.f32 %v715_v57, %v705_v52 }
  0xee   : > { %v729_v61 = vadd.f32 %v727_v58, %v717_v59  ;;  %v631_v62 = vpop.permute.xlu0 %630  ;;  %v643_v63 = vpop.permute.xlu1 %642 }
  0xef   : > { %v638_v1 = vrot.slane %v631_v62, %v2331_v51  ;;  %v650_v7 = vrot.slane %v643_v63, %v2331_v51 }
  0xf0   : > { %v812_v10 = vcombine.high %v729_v61, %v729_v61 }
  0xf1   : > { %v640_v12 = vmul.f32 %v638_v1, %v627_v60 }
  0xf2   : > { %1697 = vmatprep.subr.msk.mxu1 %vm576_vm0, %v812_v10 }
  0xf3   : > { %v652_v50 = vadd.f32 %v650_v7, %v640_v12  ;;  %1698 = vmatpush1.msk.msra.mxu1 %vm576_vm0, %v729_v61  ;;  %v902_v21 = vpop.permute.xlu1 %901  ;;  %v908_v33 = vpop.permute.xlu0 %907 }
  0xf4   : > { %1699 = vmatmul.mubr.msk.f32.vlgmr.msra.gmra.mrb[0].mxu1 %vm732_vm1, %v531_v13 }
  0xf5   : > { %v731_v14 = vcombine.high %v652_v50, %v652_v50  ;;  %1374 = vmatprep.mubr.f32.mxu1 %v2024_v5 }
  0xf7   : > { %1694 = vmatprep.subr.msk.mxu0 %vm576_vm0, %v731_v14 }
  0xf8   : > { %1695 = vmatpush1.msk.msra.mxu0 %vm576_vm0, %v652_v50  ;;  %v961_v36 = vpop.permute.xlu0 %960 }
  0xf9   : > { %1696 = vmatmul.mubr.msk.f32.vlgmr.msra.gmra.mrb[0].mxu0 %vm732_vm1, %v530_v53 }
  0xfa   : > { %1200 = vmatprep.mubr.f32.mxu0 %v2024_v5 }
  0xfd   : > { %v978_v42 = vpop.permute.xlu0 %977 }
 0x102   : > { %v995_v47 = vpop.permute.xlu0 %994 }
 0x107   : > { %v1014_v10 = vpop.permute.xlu0 %1013 }
 0x1c7   : > { %v886_v16 = vpop.f32.mrb[0].mxu1 }
 0x1c8   : > { %v888_v18 = vpop.f32.mrb[1].mxu1  ;;  %v893_v19 = vrot.slane %v886_v16, 4 }
 0x1c9   : > { %v894_v20 = vrot.slane %v888_v18, 4 }
 0x1cc   : > { %v806_v22 = vpop.f32.mrb[0].mxu0 }
 0x1cd   : > { %v897_v23 = vsel %vm576_vm0, %v806_v22, %v893_v19  ;;  %v808_v24 = vpop.f32.mrb[1].mxu0 }
 0x1ce   : > { %v904_v25 = vadd.f32 %v902_v21, %v897_v23  ;;  %v898_v26 = vsel %vm576_vm0, %v808_v24, %v894_v20  ;;  %v1031_v24 = vpop.permute.xlu0 %1030 }
 0x1cf   : > { %v905_v27 = vadd.f32 %v902_v21, %v898_v26 }
 0x1d0   : > { %1020 = vrot.lane.b32.xlu0 %v904_v25, %s2033_s18  ;;  %912 = vrot.lane.b32.xlu1 %v904_v25, %s2034_s27  ;;  %v910_v56 = vmul.f32 %v908_v33, %v904_v25 }
 0x1d1   : > { %v911_v57 = vmul.f32 %v908_v33, %v905_v27 }
 0x1d4   : > { %931 = vrot.lane.b32.xlu1 %v904_v25, %s2035_s14  ;;  %1057 = vperm.xlu0 %1824, %v2283_v6   ;;  %v925_v6 = vpop.permute.xlu1 %924 }
 0x1d8   : > { %948 = vrot.lane.b32.xlu1 %v904_v25, %s2036_s22  ;;  %1825 = vset.pattern.permute.xlu0 %v2026_v8  ;;  %v942_v28 = vpop.permute.xlu1 %941 }
 0x1dc   : > { %967 = vrot.lane.b32.xlu1 %v904_v25, %s2037_s25 }
 0x1e0   : > { %984 = vrot.lane.b32.xlu1 %v904_v25, %s2038_s20 }
 0x1e4   : > { %1001 = vrot.lane.b32.xlu1 %v904_v25, %s2039_s28 }
 0x1e8   : > { %1037 = vrot.lane.b32.xlu1 %v904_v25, %s2040_s23 }
 0x1ec   : > { %914 = vrot.lane.b32.xlu1 %v905_v27, %s2034_s27 }
 0x1f0   : > { %933 = vrot.lane.b32.xlu1 %v905_v27, %s2035_s14  ;;  %s2587_s14 = sld [smem:[#allocation19_spill]] }
 0x1f4   : > { %950 = vrot.lane.b32.xlu1 %v905_v27, %s2036_s22 }
 0x1f8   : > { %969 = vrot.lane.b32.xlu1 %v905_v27, %s2037_s25  ;;  %s1563_s25 = scalar_lea.sflag [#allocation4], %s511_s19 }
 0x1fc   : > { %986 = vrot.lane.b32.xlu1 %v905_v27, %s2038_s20  ;;  %s2043_s20 = smov [#allocation8]  }
 0x200   : > { %1003 = vrot.lane.b32.xlu1 %v905_v27, %s2039_s28  ;;  %s1949_s28 = sshll.u32 %s2043_s20, 4  ;;  %s1950_s28 = int_to_ptr.vmem [resolvable:$false] %s1949_s28 }
 0x204   : > { %1022 = vrot.lane.b32.xlu1 %v905_v27, %s2033_s18 }
 0x208   : > { %1039 = vrot.lane.b32.xlu1 %v905_v27, %s2040_s23  ;;  %s1951_s23 = scalar_lea.vmem %s1950_s28, 512 }
 0x242   : > { %v913_v30 = vpop.permute.xlu1 %912 }
 0x246   : > { %v932_v31 = vpop.permute.xlu1 %931 }
 0x24a   : > { %v949_v32 = vpop.permute.xlu1 %948 }
 0x24e   : > { %v968_v34 = vpop.permute.xlu1 %967 }
 0x252   : > { %v2352_v37 = vpop.permute.xlu1 %984 }
 0x256   : > { %v2357_v39 = vpop.permute.xlu1 %1001 }
 0x25a   : > { %v2361_v44 = vpop.permute.xlu1 %1037 }
 0x25e   : > { %v915_v48 = vpop.permute.xlu1 %914 }
 0x25f   : > { %v917_v49 = vsel %vm916_vm4, %v913_v30, %v915_v48  ;;  %v918_v52 = vsel %vm916_vm4, %v915_v48, %v913_v30  ;;  %vm1024_vm4 = vcmp.lt.s32.totalorder %v2350_v35, 112 }
 0x260   : > { %v921_v54 = vsel %vm919_vm6, %v918_v52, 0.0  ;;  %v922_v55 = vsel %vm2369_vm5, %v917_v49, 0.0  ;;  %vm1072_vm6 = vcmask 1047556  }
 0x261   : > { %v927_v58 = vmul.f32 %v925_v6, %v921_v54  ;;  %v928_v59 = vmul.f32 %v925_v6, %v922_v55 }
 0x262   : > { %v934_v60 = vpop.permute.xlu1 %933 }
 0x263   : > { %v929_v62 = vadd.f32 %v927_v58, %v910_v56  ;;  %v930_v63 = vadd.f32 %v928_v59, %v911_v57  ;;  %v936_v1 = vsel %vm935_vm7, %v932_v31, %v934_v60  ;;  %v937_v7 = vsel %vm935_vm7, %v934_v60, %v932_v31 }
 0x264   : > { %v938_v12 = vsel %vm567_vm3, %v937_v7, 0.0  ;;  %v945_v13 = vmul.f32 %v942_v28, %v936_v1  ;;  %vm1009_vm3 = vmand %vm570_vm14, %vm2369_vm5  ;;  %vm1084_vm7 = vcmask 11264  }
 0x265   : > { %v944_v50 = vmul.f32 %v942_v28, %v938_v12 }
 0x266   : > { %v947_v53 = vadd.f32 %v945_v13, %v930_v63  ;;  %v951_v15 = vpop.permute.xlu1 %950 }
 0x267   : > { %v946_v16 = vadd.f32 %v944_v50, %v929_v62  ;;  %v953_v18 = vsel %vm952_vm9, %v949_v32, %v951_v15  ;;  %v954_v19 = vsel %vm952_vm9, %v951_v15, %v949_v32 }
 0x268   : > { %v957_v20 = vsel %vm955_vm11, %v954_v19, 0.0  ;;  %v958_v21 = vsel %vm2387_vm10, %v953_v18, 0.0 }
 0x269   : > { %v963_v22 = vmul.f32 %v961_v36, %v957_v20  ;;  %v964_v23 = vmul.f32 %v961_v36, %v958_v21 }
 0x26a   : > { %v970_v25 = vpop.permute.xlu1 %969 }
 0x26b   : > { %v965_v26 = vadd.f32 %v963_v22, %v946_v16  ;;  %v966_v27 = vadd.f32 %v964_v23, %v947_v53  ;;  %v972_v6 = vsel %vm971_vm12, %v968_v34, %v970_v25  ;;  %v973_v28 = vsel %vm971_vm12, %v970_v25, %v968_v34  ;;  %v1050_v34 = vpop.permute.xlu0 %1049 }
 0x26c   : > { %v974_v30 = vsel %vm2363_vm2, %v973_v28, 0.0  ;;  %v975_v31 = vsel %vm2369_vm5, %v972_v6, 0.0  ;;  %vm1041_vm5 = vcmp.lt.s32.totalorder %v2350_v35, 111 }
 0x26d   : > { %v980_v32 = vmul.f32 %v978_v42, %v974_v30  ;;  %v981_v33 = vmul.f32 %v978_v42, %v975_v31 }
 0x26e   : > { %v987_v41 = vpop.permute.xlu1 %986 }
 0x26f   : > { %v982_v36 = vadd.f32 %v980_v32, %v965_v26  ;;  %v983_v43 = vadd.f32 %v981_v33, %v966_v27  ;;  %v989_v48 = vsel %vm988_vm13, %v2352_v37, %v987_v41  ;;  %v990_v49 = vsel %vm988_vm13, %v987_v41, %v2352_v37  ;;  %v1021_v1 = vpop.permute.xlu0 %1020 }
 0x270   : > { %v991_v52 = vsel %vm2380_vm8, %v989_v48, 0.0  ;;  %v992_v54 = vsel %vm2387_vm10, %v990_v49, 0.0 }
 0x271   : > { %v997_v55 = vmul.f32 %v995_v47, %v991_v52  ;;  %v998_v42 = vmul.f32 %v995_v47, %v992_v54 }
 0x272   : > { %v1004_v56 = vpop.permute.xlu1 %1003 }
 0x273   : > { %v999_v57 = vadd.f32 %v997_v55, %v982_v36  ;;  %v1000_v58 = vadd.f32 %v998_v42, %v983_v43  ;;  %v1006_v37 = vsel %vm1005_vm15, %v2357_v39, %v1004_v56  ;;  %v1007_v59 = vsel %vm1005_vm15, %v1004_v56, %v2357_v39  ;;  %v1058_v35 = vpop.permute.xlu0 %1057 }
 0x274   : > { %v1010_v60 = vsel %vm2363_vm2, %v1006_v37, 0.0  ;;  %v1011_v62 = vsel %vm1009_vm3, %v1007_v59, 0.0  ;;  %vm1045_vm2 = vmand %vm570_vm14, %vm2387_vm10  ;;  %v527_v59 = vld [vmem:[%s2545_s12] sm:$0x1] }
 0x275   : > { %v1016_v63 = vmul.f32 %v1014_v10, %v1010_v60  ;;  %v1017_v47 = vmul.f32 %v1014_v10, %v1011_v62 }
 0x276   : > { %v1023_v40 = vpop.permute.xlu1 %1022 }
 0x277   : > { %v1018_v7 = vadd.f32 %v1016_v63, %v999_v57  ;;  %v1019_v12 = vadd.f32 %v1017_v47, %v1000_v58  ;;  %v1025_v13 = vsel %vm1024_vm4, %v1021_v1, %v1023_v40  ;;  %v1026_v50 = vsel %vm1024_vm4, %v1023_v40, %v1021_v1 }
 0x278   : > { %v1028_v53 = vsel %vm570_vm14, %v1026_v50, 0.0  ;;  %v1033_v15 = vmul.f32 %v1031_v24, %v1025_v13  ;;  %v1096_v63 = vsub.s32 0, %v2328_v46 }
 0x279   : > { %v1034_v39 = vmul.f32 %v1031_v24, %v1028_v53 }
 0x27a   : > { %v1035_v45 = vadd.f32 %v1033_v15, %v1018_v7  ;;  %v1040_v10 = vpop.permute.xlu1 %1039 }
 0x27b   : > { %v1042_v16 = vsel %vm1041_vm5, %v2361_v44, %v1040_v10  ;;  %v1043_v18 = vsel %vm1041_vm5, %v1040_v10, %v2361_v44  ;;  %v1036_v19 = vadd.f32 %v1034_v39, %v1019_v12 }
 0x27c   : > { %v1046_v20 = vsel %vm2380_vm8, %v1042_v16, 0.0  ;;  %v1047_v21 = vsel %vm1045_vm2, %v1043_v18, 0.0  ;;  %vm1132_vm8 = vcmask 64512   ;;  %v529_v18 = vld [vmem:[%s2539_s6] sm:$0xff] }
 0x27d   : > { %v1052_v22 = vmul.f32 %v1050_v34, %v1046_v20  ;;  %v1053_v23 = vmul.f32 %v1050_v34, %v1047_v21  ;;  %v526_v34 = vld [vmem:[%s2544_s11] sm:$0xf] }
 0x27f   : > { %v1054_v24 = vadd.f32 %v1052_v22, %v1035_v45  ;;  %v1055_v25 = vadd.f32 %v1053_v23, %v1036_v19 }
 0x281   : > { %v1060_v14 = vadd.f32 %v1058_v35, %v1054_v24  ;;  %v1061_v26 = vadd.f32 %v1058_v35, %v1055_v25  ;;  %v1207_v24 = vadd.f32 %v2291_v9, %v2302_v11 }
 0x283   : > { %v1064_v38 = vmul.f32 0.70710677, %v1060_v14  ;;  %v1065_v27 = vmul.f32 0.70710677, %v1061_v26  ;;  %v1062_v30 = vmul.f32 0.5, %v1060_v14  ;;  %v1063_v31 = vmul.f32 0.5, %v1061_v26 }
 0x285   : > { %1845 = verf.f32 %v1064_v38 }
 0x286   : > { %1847 = verf.f32 %v1065_v27 }
 0x28f   : > { %v1846_v6 = vpop.eup %1845 }
 0x290   : > { %v1848_v28 = vpop.eup %1847  ;;  %v1068_v44 = vadd.f32 1.0, %v1846_v6 }
 0x291   : > { %v1069_v32 = vadd.f32 1.0, %v1848_v28 }
 0x292   : > { %v1070_v61 = vmul.f32 %v1068_v44, %v1062_v30 }
 0x293   : > { %v1071_v33 = vmul.f32 %v1069_v32, %v1063_v31 }
 0x294   : > { %v1073_v41 = vsel %vm1072_vm6, %v1070_v61, 0.0 }
 0x295   : > { %v1074_v36 = vsel %vm1072_vm6, %v1071_v33, 0.0 }
 0x296   : > { %v1075_v43 = vadd.f32 %v1074_v36, %v1073_v41 }
 0x298   : > { %1076 = vadd.xlane.f32.xlu0 %v1075_v43 }
 0x325   : > { %v1077_v48 = vpop.xlane.xlu0 %1076 }
 0x326   : > { %v1079_v49 = vmul.f32 0.00390625, %v1077_v48 }
 0x328   : > { %v1081_v52 = vrot.slane %v1079_v49, 4 }
 0x32a   : > { %v1083_v54 = vmul.f32 %v1081_v52, %v526_v34 }
 0x32c   : > { %v1085_v55 = vsel %vm1084_vm7, %v1083_v54, 0.0 }
 0x32d   : > { %v1086_v42 = vrot.slane %v1085_v55, 4 }
 0x32f   : > { %v1087_v56 = vadd.f32 %v1086_v42, %v1085_v55 }
 0x331   : > { %v1088_v57 = vrot.slane %v1087_v56, 2 }
 0x333   : > { %v1089_v58 = vadd.f32 %v1088_v57, %v1087_v56 }
 0x335   : > { %v1090_v37 = vrot.slane %v1089_v58, 1 }
 0x337   : > { %v1091_v60 = vadd.f32 %v1090_v37, %v1089_v58 }
 0x339   : > { %v1092_v62 = vadd.f32 %v1091_v60, %v527_v59 }
 0x33b   : > { %v1093_v47 = vmax.f32 %v1092_v62, 0.0 }
 0x33d   : > { %v1097_v1 = vrot.slane %v1093_v47, %v1096_v63 }
 0x33f   : > { %1099 = vrot.lane.b32.xlu1 %v1097_v1, %s2041_s26  ;;  %s1716_s26 = sshll.u32 %s2140_s17, 8 }
 0x340   : > { %s2491_s22 = scalar_lea.hbm %s2587_s14, %s1716_s26 }
 0x3b1   : > { %v1100_v40 = vpop.permute.xlu1 %1099 }
 0x3b2   : > { %v1102_v7 = vmul.f32 %v1100_v40, %v526_v34 }
 0x3b4   : > { %1104 = vrot.lane.b32.xlu1 %v1102_v7, %s2042_s21  ;;  %s513_s21 = scalar_lea.vmem [#allocation8], %s1689_s16 }
 0x3b5   : > { %s1577_s15 = sshll.u32 %s513_s21, 4  ;;  %s2493_s15 = int_to_ptr.vmem [resolvable:$true] %s1577_s15 }
 0x3b6   : > { %s1945_s17 = scalar_lea.vmem %s2493_s15, 256  ;;  %p1952_p4 = scmp.lt.s32.totalorder %s2493_s15, %s1950_s28 }
 0x3b7   : > { %p1946_p9 = scmp.ne.s32.totalorder %s2493_s15, %s1945_s17  ;;  %p1953_p7 = scmp.lt.s32.totalorder %s1951_s23, %s1945_s17 }
 0x3b9   : > { %p1947_p2 = pnand %p1946_p9, %p2588_p10  ;;  %p1954_p8 = por %p1953_p7, %p1952_p4 }
 0x3bb   : > { %p1948_p3 = pneg %p1947_p2 }
 0x3bd   : > { %p1955_p11 = pnand %p1954_p8, %p1948_p3 }
 0x426   : > { %v1105_v12 = vpop.permute.xlu1 %1104 }
 0x427   : > { %v1107_v13 = vsel %vm1084_vm7, %v1105_v12, 0.0 }
 0x428   : > { %1108 = vadd.xlane.f32.xlu1 %v1107_v13 }
 0x439   : > { %1129 = vperm.xlu1 %1826, %v2268_v2  }
 0x43d   : > { %1827 = vset.pattern.permute.xlu1 %v2029_v29 }
 0x43e   : > { %1209 = vperm.xlu1 %1827, %v2268_v2  }
 0x442   : > { %1828 = vset.pattern.permute.xlu1 %v2026_v8 }
 0x443   : > { %1273 = vperm.xlu1 %1828, %v2268_v2  }
 0x447   : > { %1829 = vset.pattern.permute.xlu1 %v2027_v17 }
 0x448   : > { %1285 = vperm.xlu1 %1829, %v2268_v2   ;;  %v532_v2 = vld [vmem:[#allocation7] sm:$0xf] }
 0x44c   : > { %1830 = vset.pattern.permute.xlu1 %v2022_v3 }
 0x44d   : > { %1298 = vperm.xlu1 %1830, %v529_v18  }
 0x451   : > { %1832 = vset.pattern.permute.xlu1 %v2023_v4 }
 0x4b5   : > { %v1109_v46 = vpop.xlane.xlu1 %1108 }
 0x4b6   : > { %v1110_v50 = vadd.f32 %v1109_v46, %v526_v34 }
 0x4b8   : > { %v1700_v53 = vmul.f32 -1.442695, %v1110_v50 }
 0x4b9   : > { %v1130_v19 = vpop.permute.xlu1 %1129 }
 0x4ba   : > { %1849 = vpow2.f32 %v1700_v53 }
 0x4bd   : > { %v1210_v20 = vpop.permute.xlu1 %1209 }
 0x4c2   : > { %v1274_v53 = vpop.permute.xlu1 %1273 }
 0x4c4   : > { %v1850_v15 = vpop.eup %1849 }
 0x4c5   : > { %v1114_v39 = vadd.f32 1.0, %v1850_v15 }
 0x4c7   : > { %1851 = vrcp.f32 %v1114_v39 }
 0x4d1   : > { %v1852_v29 = vpop.eup %1851 }
 0x4d2   : > { %v1118_v45 = vrot.slane %v1852_v29, 4 }
 0x4d4   : > { %v1120_v10 = vsel %vm576_vm0, %v1852_v29, %v1118_v45  ;;  %v1286_v29 = vpop.permute.xlu1 %1285 }
 0x4d5   : > { %1123 = vperm.xlu0 %1825, %v1120_v10  }
 0x4d9   : > { %1831 = vset.pattern.permute.xlu0 %v2022_v3 }
 0x554   : > { %v1124_v8 = vpop.permute.xlu0 %1123 }
 0x555   : > { %v1126_v17 = vmul.f32 %v1124_v8, %v1070_v61  ;;  %v1127_v16 = vmul.f32 %v1124_v8, %v1071_v33  ;;  %v1281_v8 = vrot.slane %v1274_v53, %v2331_v51 }
 0x557   : > { %1136 = vmatprep.subr.mxu0 %v1127_v16 }
 0x558   : > { %1137 = vmatpush1.msra.mxu0 %v1126_v17  ;;  %v1293_v17 = vrot.slane %v1286_v29, %v2331_v51  ;;  %v535_v51 = vld [vmem:[%s2541_s8] sm:$0xff] }
 0x559   : > { %1701 = vmatmul.mubr.msk.f32.vlgmr.msra.gmra.mrb[2].mxu0 %vm1132_vm8, %v532_v2 }
 0x55a   : > { %1463 = vmatprep.mubr.f32.mxu0 %v2024_v5 }
 0x62c   : > { %v1202_v3 = vpop.f32.mrb[2].mxu0 }
 0x62d   : > { %v1203_v21 = vadd.f32 %v1202_v3, %v1130_v19  ;;  %v1204_v22 = vpop.f32.mrb[3].mxu0  ;;  %v528_v3 = vld [vmem:[%s2546_s13] sm:$0xff] }
 0x62e   : > { %v1205_v23 = vadd.f32 %v1204_v22, %v1130_v19  ;;  %v533_v19 = vld [vmem:[%s2538_s5] sm:$0xff]  ;;  %1471 = vperm.xlu1 %1832, %v528_v3   ;;  %1393 = vperm.xlu0 %1831, %v528_v3  }
 0x62f   : > { %v1212_v35 = vmul.f32 %v1210_v20, %v1203_v21 }
 0x630   : > { %v1213_v25 = vmul.f32 %v1210_v20, %v1205_v23  ;;  %v1299_v20 = vpop.permute.xlu1 %1298 }
 0x632   : > { %v1216_v14 = vcombine.low %v1212_v35, %v1213_v25  ;;  %1833 = vset.pattern.permute.xlu1 %v2020_v0  ;;  %1834 = vset.pattern.permute.xlu0 %v2020_v0  ;;  %v534_v0 = vld [vmem:[%s2540_s7] sm:$0xff] }
 0x633   : > { %1553 = vperm.xlu1 %1833, %v528_v3  }
 0x634   : > { %v1218_v26 = vadd.f32 %v1216_v14, %v1207_v24 }
 0x636   : > { %v1220_v38 = vcombine.high %v1218_v26, %v1218_v26  ;;  %v1222_v27 = vsel %vm576_vm0, %v1218_v26, 0.0 }
 0x637   : > { %v1223_v6 = vrot.slane %v1222_v27, 4 }
 0x638   : > { %v1229_v28 = vsel %vm576_vm0, %v1220_v38, 0.0 }
 0x639   : > { %v1224_v4 = vadd.f32 %v1223_v6, %v1222_v27  ;;  %v1230_v30 = vrot.slane %v1229_v28, 4 }
 0x63b   : > { %v1225_v44 = vrot.slane %v1224_v4, 2  ;;  %v1231_v31 = vadd.f32 %v1230_v30, %v1229_v28 }
 0x63d   : > { %v1226_v32 = vadd.f32 %v1225_v44, %v1224_v4  ;;  %v1232_v61 = vrot.slane %v1231_v31, 2 }
 0x63f   : > { %v1227_v33 = vrot.slane %v1226_v32, 1  ;;  %v1233_v41 = vadd.f32 %v1232_v61, %v1231_v31 }
 0x641   : > { %v1228_v36 = vadd.f32 %v1227_v33, %v1226_v32  ;;  %v1234_v43 = vrot.slane %v1233_v41, 1 }
 0x643   : > { %v1235_v9 = vadd.f32 %v1234_v43, %v1233_v41  ;;  %v1236_v11 = vmul.f32 0.25, %v1228_v36 }
 0x645   : > { %v1237_v48 = vmul.f32 0.25, %v1235_v9 }
 0x647   : > { %v1240_v49 = vcombine.low %v1236_v11, %v1237_v48 }
 0x649   : > { %v1242_v34 = vsub.f32 %v1218_v26, %v1240_v49 }
 0x64b   : > { %v1243_v52 = vmul.f32 %v1242_v34, %v1242_v34 }
 0x64d   : > { %v1245_v54 = vcombine.high %v1243_v52, %v1243_v52  ;;  %v1247_v55 = vsel %vm576_vm0, %v1243_v52, 0.0 }
 0x64e   : > { %v1248_v42 = vrot.slane %v1247_v55, 4 }
 0x64f   : > { %v1254_v56 = vsel %vm576_vm0, %v1245_v54, 0.0 }
 0x650   : > { %v1249_v57 = vadd.f32 %v1248_v42, %v1247_v55  ;;  %v1255_v58 = vrot.slane %v1254_v56, 4 }
 0x652   : > { %v1250_v37 = vrot.slane %v1249_v57, 2  ;;  %v1256_v59 = vadd.f32 %v1255_v58, %v1254_v56 }
 0x654   : > { %v1251_v60 = vadd.f32 %v1250_v37, %v1249_v57  ;;  %v1257_v62 = vrot.slane %v1256_v59, 2 }
 0x656   : > { %v1252_v63 = vrot.slane %v1251_v60, 1  ;;  %v1258_v47 = vadd.f32 %v1257_v62, %v1256_v59 }
 0x658   : > { %v1253_v1 = vadd.f32 %v1252_v63, %v1251_v60  ;;  %v1259_v40 = vrot.slane %v1258_v47, 1 }
 0x65a   : > { %v1260_v7 = vadd.f32 %v1259_v40, %v1258_v47  ;;  %v1261_v12 = vmul.f32 0.25, %v1253_v1 }
 0x65c   : > { %v1262_v13 = vmul.f32 0.25, %v1260_v7  ;;  %v1263_v46 = vadd.f32 1e-06, %v1261_v12 }
 0x65e   : > { %v1264_v50 = vadd.f32 1e-06, %v1262_v13  ;;  %1853 = vrsqrt.f32 %v1263_v46 }
 0x660   : > { %1855 = vrsqrt.f32 %v1264_v50 }
 0x668   : > { %v1854_v15 = vpop.eup %1853 }
 0x66a   : > { %v1856_v39 = vpop.eup %1855 }
 0x66b   : > { %v1269_v45 = vcombine.low %v1854_v15, %v1856_v39 }
 0x66d   : > { %v1271_v10 = vmul.f32 %v1269_v45, %v1242_v34 }
 0x66f   : > { %v1283_v16 = vmul.f32 %v1281_v8, %v1271_v10 }
 0x671   : > { %v1295_v2 = vadd.f32 %v1293_v17, %v1283_v16 }
 0x673   : > { %v1302_v18 = vcombine.high %v1295_v2, %v1295_v2 }
 0x675   : > { %1702 = vmatprep.subr.msk.mxu1 %vm576_vm0, %v1302_v18 }
 0x676   : > { %1703 = vmatpush1.msk.msra.mxu1 %vm576_vm0, %v1295_v2 }
 0x677   : > { %1704 = vmatmul.mubr.msk.f32.vlgmr.msra.gmra.mrb[2].mxu1 %vm732_vm1, %v533_v19  ;;  %1706 = vmatprep.subr.msk.mxu1 %vm576_vm0, %v1220_v38 }
 0x678   : > { %1707 = vmatpush1.msk.msra.mxu1 %vm576_vm0, %v1218_v26  ;;  %1545 = vmatprep.mubr.f32.mxu1 %v2024_v5 }
 0x67b   : > { %1708 = vmatmul.mubr.msk.f32.vlgmr.msra.gmra.mrb[4].mxu1 %vm732_vm1, %v535_v51 }
 0x6ad   : > { %v1472_v31 = vpop.permute.xlu1 %1471  ;;  %v1394_v32 = vpop.permute.xlu0 %1393 }
 0x6b2   : > { %v1554_v33 = vpop.permute.xlu1 %1553 }
 0x74a   : > { %v1376_v21 = vpop.f32.mrb[2].mxu1 }
 0x74b   : > { %v1377_v5 = vadd.f32 %v1376_v21, %v1299_v20  ;;  %v1378_v22 = vpop.f32.mrb[3].mxu1 }
 0x74c   : > { %v1379_v23 = vadd.f32 %v1378_v22, %v1299_v20 }
 0x74d   : > { %v1383_v35 = vmul.f32 0.70710677, %v1377_v5  ;;  %v1381_v6 = vmul.f32 0.5, %v1377_v5 }
 0x74e   : > { %v1384_v24 = vmul.f32 0.70710677, %v1379_v23  ;;  %v1382_v38 = vmul.f32 0.5, %v1379_v23  ;;  %v1547_v30 = vpop.f32.mrb[4].mxu1 }
 0x74f   : > { %1857 = verf.f32 %v1383_v35  ;;  %v1549_v44 = vpop.f32.mrb[5].mxu1  ;;  %v1548_v9 = vadd.f32 %v1547_v30, %v1472_v31 }
 0x750   : > { %1859 = verf.f32 %v1384_v24  ;;  %v1550_v48 = vadd.f32 %v1549_v44, %v1472_v31 }
 0x759   : > { %v1858_v25 = vpop.eup %1857 }
 0x75a   : > { %v1860_v14 = vpop.eup %1859  ;;  %v1387_v26 = vadd.f32 1.0, %v1858_v25 }
 0x75b   : > { %v1388_v27 = vadd.f32 1.0, %v1860_v14 }
 0x75c   : > { %v1389_v4 = vmul.f32 %v1387_v26, %v1381_v6 }
 0x75d   : > { %v1390_v28 = vmul.f32 %v1388_v27, %v1382_v38 }
 0x75f   : > { %1399 = vmatprep.subr.mxu0 %v1390_v28 }
 0x760   : > { %1400 = vmatpush1.msra.mxu0 %v1389_v4 }
 0x761   : > { %1705 = vmatmul.mubr.msk.f32.vlgmr.msra.gmra.mrb[4].mxu0 %vm1132_vm8, %v534_v0 }
 0x834   : > { %v1465_v61 = vpop.f32.mrb[4].mxu0 }
 0x835   : > { %v1466_v41 = vadd.f32 %v1465_v61, %v1394_v32  ;;  %v1467_v36 = vpop.f32.mrb[5].mxu0 }
 0x836   : > { %v1468_v43 = vadd.f32 %v1467_v36, %v1394_v32 }
 0x837   : > { %v1556_v11 = vmul.f32 %v1554_v33, %v1466_v41 }
 0x838   : > { %v1557_v49 = vmul.f32 %v1554_v33, %v1468_v43 }
 0x839   : > { %v1558_v34 = vadd.f32 %v1556_v11, %v1548_v9 }
 0x83a   : > { %v1559_v52 = vadd.f32 %v1557_v49, %v1550_v48 }
 0x83b   : > { %1560 = vst [vmem:[%s513_s21] sm:$0xff] %v1558_v34 }
 0x83c   : > { %1561 = vst [vmem:[%s513_s21 + $0x8] sm:$0xff] %v1559_v52 }
 0x83d   : > { %1958 = shalt.err (!%p1955_p11)
}
 0x83e   : > { %s1959_s29 = scalar_lea.hbm %s2491_s22, 256  ;;  %s1963_s26 = scalar_lea.hbm %s2587_s14, 512 }
 0x83f   : > { %p1960_p13 = scmp.ne.s32.totalorder %s2491_s22, %s1959_s29  ;;  %p1964_p6 = scmp.lt.u32.totalorder %s2491_s22, %s2587_s14 }
 0x840   : > { %p1965_p5 = scmp.lt.u32.totalorder %s1963_s26, %s1959_s29  ;;  %p1967_p9 = scmp.lt.u32.totalorder %s1959_s29, %s2491_s22 }
 0x841   : > { %p1961_p1 = pnand %p1960_p13, %p2588_p10 }
 0x842   : > { %p1966_p12 = por %p1965_p5, %p1964_p6 }
 0x843   : > { %p1962_p0 = pneg %p1961_p1 }
 0x844   : > { %p1968_p2 = por %p1967_p9, %p1966_p12 }
 0x846   : > { %p1969_p3 = pnand %p1968_p2, %p1962_p0 }
 0x848   : > { %1972 = shalt.err (!%p1969_p3)
}
 0x849   : > { %1729 = dma.vmem_to_hbm [thread:$0]  (%p2588_p10), %s2493_s15, 256, %s2491_s22, %s1563_s25  }
 0x84a PF: > { %s2589_s27 = sld [smem:[#allocation14_spill]]  ;;  %s2590_s17 = sld [smem:[#allocation12_spill]] }
 0x84b   : > { %s2591_s20 = sld [smem:[#allocation18_spill]] }
 0x850   : > { %p1751_p4 = scmp.ge.s32.totalorder %s2589_s27, 2  ;;  %s1589_s28 = sand.u32 1, %s2590_s17  }
 0x851   : > { %p2592_p7 = scmp.ne.s32.totalorder %s2591_s20, 0  ;;  %s1590_s23 = scalar_lea.sflag [#allocation4], %s1589_s28 }
 0x853   : > { %p1742_p8 = pnand %p1751_p4, %p2592_p7 }
 0x855   : > { %1998 = dma.done.wait (!%p1742_p8), %s1590_s23, 256  }
 0x856   : > { %2000 = vsyncadd (!%p1742_p8), %s1590_s23, 4294967040  ;;  %s2593_s16 = sld [smem:[#allocation15_spill]]  ;;  %s2594_s19 = sld [smem:[#allocation13_spill]] }
 0x857   : > { %s2595_s15 = sld [smem:[#allocation16_spill]]  ;;  %s2596_s29 = smov %s2007_s30 }
 0x85c   : > { %p26_p11 = scmp.ge.s32.totalorder %s2593_s16, 4   ;;  %s2597_s30 = smov %s2594_s19 }
 0x85e   :  { %28 = sbr.rel (!%p26_p11) target bundleno = 7 (0x7), region = 127 }
 0x865   :  { %1595 = vsyncpa [#allocation3], 1 }
 0x866   :  { %1597 = vsyncpa [#allocation3 + $0x1], 1 }
 0x867   :  { %1598 = vsyncpa [#allocation6], 1 }
 0x868   :  { %1599 = vsyncpa [#allocation4], 1 }
 0x869   :  { %1601 = vsyncpa [#allocation4 + $0x1], 1 }

</bundles_post_ra>
